<compile_context>
chip_gen: v7x
topology: tpu7x:2x2x1
jax: 0.10.0
libtpu: 0.0.40
codegen_flags: <defaults>
</compile_context>

<pallas_src>
import functools

import jax
import jax.numpy as jnp
from jax.experimental import pallas as pl
from jax.experimental.pallas import tpu as pltpu


def _round_up(x, m):
    return (x + m - 1) // m * m


def _conv_kernel(x_ref, w_ref, b_ref, o_ref, *, ksize, w_padded, length):
    """Per-tap matmul-accumulate convolution for one batch element.

    x_ref: (1, C_in, Lp_in)    bf16 flattened (padded) input image in VMEM
    w_ref: (K*K, C_out, C_in)  bf16 weights, tap-major (t = kh*K + kw)
    b_ref: (C_out, 1)          f32 bias
    o_ref: (1, C_out, L_pad)   lane-dense flat output (L_pad % 128 == 0)
    """
    c_out = o_ref.shape[1]
    acc = jnp.zeros((c_out, length), jnp.float32)
    # K*K tiny MXU matmuls accumulated in registers.  Each tap's input is a
    # contiguous lane slice of the flat image: no im2col scratch, no
    # cross-sublane relayout, no VMEM->VMEM store traffic.
    for i in range(ksize):
        for j in range(ksize):
            t = i * ksize + j
            off = i * w_padded + j
            acc = acc + jnp.dot(
                w_ref[t], x_ref[0, :, off:off + length],
                preferred_element_type=jnp.float32)
    acc = acc + b_ref[...].astype(jnp.float32)          # (C_out, 1) broadcast
    o_ref[...] = acc[None].astype(o_ref.dtype)


def conv_block_forward(x_nchw, weight_oihw, bias, *, kernel_size, stride,
                       upsample=False):
    """Pallas implementation of ConvBlock.forward (NCHW in, NCHW out).

    x_nchw:      (N, C_in, H, W)
    weight_oihw: (C_out, C_in, K, K)   (PyTorch Conv2d layout)
    bias:        (C_out,)
    """
    N, C_in, H, W = x_nchw.shape
    C_out = weight_oihw.shape[0]
    K = kernel_size
    pad = K // 2
    out_dtype = x_nchw.dtype

    # bf16 operands, f32 accumulation in-kernel (halves HBM/VMEM bytes,
    # fast MXU path).  Quantizing before upsample/pad is value-identical to
    # quantizing after (both ops only replicate values).
    x = x_nchw.astype(jnp.bfloat16)

    # --- cheap XLA glue: nearest-x2 upsample + reflection pad ---------------
    # TODO(synk): fuse into the kernel (see module header).
    if upsample:
        x = jnp.repeat(jnp.repeat(x, 2, axis=2), 2, axis=3)
    if pad:
        x = jnp.pad(x, ((0, 0), (0, 0), (pad, pad), (pad, pad)),
                    mode="reflect")
    _, _, H_p, W_p = x.shape

    # Full (stride-1) "VALID" conv output extents.
    H_full = H_p - K + 1
    W_full = W_p - K + 1

    # Lane-dense flat output length (columns m = h*W_p + w, h < H_full),
    # rounded up to a full 128-lane vreg so every store is an unmasked vst
    # and the wrapper reshape needs no extra pad.
    L_pad = _round_up(H_full * W_p, 128)
    # The furthest tap slice starts at (K-1)*(W_p+1); pad the flat input so it
    # stays in-bounds (tail columns compute garbage that the wrapper drops).
    Lp_in = _round_up((K - 1) * (W_p + 1) + L_pad, 128)

    x_flat = x.reshape(N, C_in, H_p * W_p)
    x_flat = jnp.pad(x_flat, ((0, 0), (0, 0), (0, Lp_in - H_p * W_p)))

    # Tap-major weights: w_taps[t] = weight[:, :, t // K, t % K] -> (C_out, C_in).
    w_taps = jnp.transpose(weight_oihw, (2, 3, 0, 1)).reshape(
        K * K, C_out, C_in).astype(jnp.bfloat16)
    b2 = bias.reshape(C_out, 1).astype(jnp.float32)

    kernel = functools.partial(_conv_kernel, ksize=K, w_padded=W_p,
                               length=L_pad)

    flops = 2 * N * K * K * C_out * C_in * L_pad
    bytes_accessed = (x_flat.size * x_flat.dtype.itemsize
                      + w_taps.size * w_taps.dtype.itemsize
                      + b2.size * b2.dtype.itemsize
                      + N * C_out * L_pad * jnp.dtype(out_dtype).itemsize)

    out_flat = pl.pallas_call(
        kernel,
        out_shape=jax.ShapeDtypeStruct((N, C_out, L_pad), out_dtype),
        grid=(N,),
        in_specs=[
            pl.BlockSpec((1, C_in, Lp_in), lambda n: (n, 0, 0)),
            pl.BlockSpec((K * K, C_out, C_in), lambda n: (0, 0, 0)),
            pl.BlockSpec((C_out, 1), lambda n: (0, 0)),
        ],
        out_specs=pl.BlockSpec((1, C_out, L_pad), lambda n: (n, 0, 0)),
        compiler_params=pltpu.CompilerParams(
            dimension_semantics=("parallel",)),
        cost_estimate=pl.CostEstimate(flops=flops, transcendentals=0,
                                      bytes_accessed=bytes_accessed),
    )(x_flat, w_taps, b2)

    # NCHW reassembly: drop the trailing pad columns and the (K-1)
    # wrap-around columns per row (end-of-row/start-of-next-row mix).
    out = out_flat[:, :, :H_full * W_p].reshape(N, C_out, H_full, W_p)
    out = out[:, :, :, :W_full]
    if stride > 1:
        # TODO(synk): subsample inside the kernel instead (stride=1 + slice
        # wastes matmul work and output bandwidth for stride>1).
        out = out[:, :, ::stride, ::stride]
    return out


def _reference(x_nchw, weight_oihw, bias, *, kernel_size, stride, upsample):
    """Pure-JAX reference (lax.conv) for correctness checking."""
    x = x_nchw
    if upsample:
        x = jnp.repeat(jnp.repeat(x, 2, axis=2), 2, axis=3)
    pad = kernel_size // 2
    if pad:
        x = jnp.pad(x, ((0, 0), (0, 0), (pad, pad), (pad, pad)),
                    mode="reflect")
    out = jax.lax.conv_general_dilated(
        x, weight_oihw, (stride, stride), "VALID",
        dimension_numbers=("NCHW", "OIHW", "NCHW"))
    return out + bias[None, :, None, None]


if __name__ == "__main__":
    # Module config: ConvBlock(in_channels=4, out_channels=8, kernel_size=3,
    #                          stride=1, upsample=True)
    N, C_in, C_out, H, W = 2, 4, 8, 16, 16
    kernel_size, stride, upsample = 3, 1, True

    key = jax.random.PRNGKey(0)
    kx, kw, kb = jax.random.split(key, 3)
    x = jax.random.normal(kx, (N, C_in, H, W), dtype=jnp.float32)
    # Deterministic synthetic Conv2d parameters (PyTorch OIHW layout).
    weight = jax.random.normal(kw, (C_out, C_in, kernel_size, kernel_size),
                               dtype=jnp.float32) * 0.1
    bias = jax.random.normal(kb, (C_out,), dtype=jnp.float32) * 0.1

    out = conv_block_forward(x, weight, bias, kernel_size=kernel_size,
                             stride=stride, upsample=upsample)
    out = jax.block_until_ready(out)

    # Tight check against the reference run on bf16-quantized operands
    # (isolates kernel math from the deliberate bf16 operand quantization).
    x_q = x.astype(jnp.bfloat16).astype(jnp.float32)
    w_q = weight.astype(jnp.bfloat16).astype(jnp.float32)
    ref_q = _reference(x_q, w_q, bias, kernel_size=kernel_size, stride=stride,
                       upsample=upsample)
    assert out.shape == ref_q.shape, (out.shape, ref_q.shape)
    assert jnp.allclose(out, ref_q, atol=2e-3, rtol=2e-3), \
        float(jnp.max(jnp.abs(out - ref_q)))

    # Looser sanity check against the full-f32 module semantics.
    ref_f32 = _reference(x, weight, bias, kernel_size=kernel_size,
                         stride=stride, upsample=upsample)
    assert jnp.allclose(out, ref_f32, atol=1e-1, rtol=1e-1), \
        float(jnp.max(jnp.abs(out - ref_f32)))

    print("KERNEL_OK")
</pallas_src>

<mosaic_0001>
module attributes {stable_mosaic.version = 11 : i64} {
  func.func @_conv_kernel(%arg0: i32, %arg1: memref<1x4x1280xbf16, #tpu.memory_space<vmem>>, %arg2: memref<9x8x4xbf16, #tpu.memory_space<vmem>>, %arg3: memref<8x1xf32, #tpu.memory_space<vmem>>, %arg4: memref<1x8x1152xf32, #tpu.memory_space<vmem>>) attributes {dimension_semantics = [#tpu.dimension_semantics<parallel>], iteration_bounds = array<i64: 2>, scalar_prefetch = 0 : i64, scratch_operands = 0 : i64, tpu.core_type = #tpu.core_type<tc>, window_params = [{transform_indices = @transform_0, window_bounds = array<i64: 1, 4, 1280>}, {pipeline_mode = #tpu.pipeline_mode<synchronous>, transform_indices = @transform_1, window_bounds = array<i64: 9, 8, 4>}, {pipeline_mode = #tpu.pipeline_mode<synchronous>, transform_indices = @transform_2, window_bounds = array<i64: 8, 1>}, {transform_indices = @transform_3, window_bounds = array<i64: 1, 8, 1152>}]} {
    %cst = arith.constant 0.000000e+00 : f32
    %0 = vector.broadcast %cst : f32 to vector<8x1152xf32>
    %c0 = arith.constant 0 : index
    %c0_0 = arith.constant 0 : index
    %c0_1 = arith.constant 0 : index
    %1 = vector.load %arg2[%c0, %c0_0, %c0_1] : memref<9x8x4xbf16, #tpu.memory_space<vmem>>, vector<1x8x4xbf16>
    %2 = vector.shape_cast %1 : vector<1x8x4xbf16> to vector<8x4xbf16>
    %c0_2 = arith.constant 0 : index
    %c0_3 = arith.constant 0 : index
    %c0_4 = arith.constant 0 : index
    %3 = vector.load %arg1[%c0_2, %c0_3, %c0_4] : memref<1x4x1280xbf16, #tpu.memory_space<vmem>>, vector<1x4x1152xbf16>
    %4 = vector.shape_cast %3 : vector<1x4x1152xbf16> to vector<4x1152xbf16>
    %cst_5 = arith.constant dense<0.000000e+00> : vector<8x1152xf32>
    %5 = tpu.matmul %2, %4, %cst_5 {dimension_numbers = #tpu.dot_dimension_numbers<[1], [0], [0], [1], [0, 0, 1, 1], [], []>} : vector<8x4xbf16>, vector<4x1152xbf16>, vector<8x1152xf32> -> vector<8x1152xf32>
    %6 = arith.addf %0, %5 : vector<8x1152xf32>
    %c1 = arith.constant 1 : index
    %c0_6 = arith.constant 0 : index
    %c0_7 = arith.constant 0 : index
    %7 = vector.load %arg2[%c1, %c0_6, %c0_7] : memref<9x8x4xbf16, #tpu.memory_space<vmem>>, vector<1x8x4xbf16>
    %8 = vector.shape_cast %7 : vector<1x8x4xbf16> to vector<8x4xbf16>
    %c0_8 = arith.constant 0 : index
    %c0_9 = arith.constant 0 : index
    %c1_10 = arith.constant 1 : index
    %9 = vector.load %arg1[%c0_8, %c0_9, %c1_10] : memref<1x4x1280xbf16, #tpu.memory_space<vmem>>, vector<1x4x1152xbf16>
    %10 = vector.shape_cast %9 : vector<1x4x1152xbf16> to vector<4x1152xbf16>
    %cst_11 = arith.constant dense<0.000000e+00> : vector<8x1152xf32>
    %11 = tpu.matmul %8, %10, %cst_11 {dimension_numbers = #tpu.dot_dimension_numbers<[1], [0], [0], [1], [0, 0, 1, 1], [], []>} : vector<8x4xbf16>, vector<4x1152xbf16>, vector<8x1152xf32> -> vector<8x1152xf32>
    %12 = arith.addf %6, %11 : vector<8x1152xf32>
    %c2 = arith.constant 2 : index
    %c0_12 = arith.constant 0 : index
    %c0_13 = arith.constant 0 : index
    %13 = vector.load %arg2[%c2, %c0_12, %c0_13] : memref<9x8x4xbf16, #tpu.memory_space<vmem>>, vector<1x8x4xbf16>
    %14 = vector.shape_cast %13 : vector<1x8x4xbf16> to vector<8x4xbf16>
    %c0_14 = arith.constant 0 : index
    %c0_15 = arith.constant 0 : index
    %c2_16 = arith.constant 2 : index
    %15 = vector.load %arg1[%c0_14, %c0_15, %c2_16] : memref<1x4x1280xbf16, #tpu.memory_space<vmem>>, vector<1x4x1152xbf16>
    %16 = vector.shape_cast %15 : vector<1x4x1152xbf16> to vector<4x1152xbf16>
    %cst_17 = arith.constant dense<0.000000e+00> : vector<8x1152xf32>
    %17 = tpu.matmul %14, %16, %cst_17 {dimension_numbers = #tpu.dot_dimension_numbers<[1], [0], [0], [1], [0, 0, 1, 1], [], []>} : vector<8x4xbf16>, vector<4x1152xbf16>, vector<8x1152xf32> -> vector<8x1152xf32>
    %18 = arith.addf %12, %17 : vector<8x1152xf32>
    %c3 = arith.constant 3 : index
    %c0_18 = arith.constant 0 : index
    %c0_19 = arith.constant 0 : index
    %19 = vector.load %arg2[%c3, %c0_18, %c0_19] : memref<9x8x4xbf16, #tpu.memory_space<vmem>>, vector<1x8x4xbf16>
    %20 = vector.shape_cast %19 : vector<1x8x4xbf16> to vector<8x4xbf16>
    %c0_20 = arith.constant 0 : index
    %c0_21 = arith.constant 0 : index
    %c34 = arith.constant 34 : index
    %21 = vector.load %arg1[%c0_20, %c0_21, %c34] : memref<1x4x1280xbf16, #tpu.memory_space<vmem>>, vector<1x4x1152xbf16>
    %22 = vector.shape_cast %21 : vector<1x4x1152xbf16> to vector<4x1152xbf16>
    %cst_22 = arith.constant dense<0.000000e+00> : vector<8x1152xf32>
    %23 = tpu.matmul %20, %22, %cst_22 {dimension_numbers = #tpu.dot_dimension_numbers<[1], [0], [0], [1], [0, 0, 1, 1], [], []>} : vector<8x4xbf16>, vector<4x1152xbf16>, vector<8x1152xf32> -> vector<8x1152xf32>
    %24 = arith.addf %18, %23 : vector<8x1152xf32>
    %c4 = arith.constant 4 : index
    %c0_23 = arith.constant 0 : index
    %c0_24 = arith.constant 0 : index
    %25 = vector.load %arg2[%c4, %c0_23, %c0_24] : memref<9x8x4xbf16, #tpu.memory_space<vmem>>, vector<1x8x4xbf16>
    %26 = vector.shape_cast %25 : vector<1x8x4xbf16> to vector<8x4xbf16>
    %c0_25 = arith.constant 0 : index
    %c0_26 = arith.constant 0 : index
    %c35 = arith.constant 35 : index
    %27 = vector.load %arg1[%c0_25, %c0_26, %c35] : memref<1x4x1280xbf16, #tpu.memory_space<vmem>>, vector<1x4x1152xbf16>
    %28 = vector.shape_cast %27 : vector<1x4x1152xbf16> to vector<4x1152xbf16>
    %cst_27 = arith.constant dense<0.000000e+00> : vector<8x1152xf32>
    %29 = tpu.matmul %26, %28, %cst_27 {dimension_numbers = #tpu.dot_dimension_numbers<[1], [0], [0], [1], [0, 0, 1, 1], [], []>} : vector<8x4xbf16>, vector<4x1152xbf16>, vector<8x1152xf32> -> vector<8x1152xf32>
    %30 = arith.addf %24, %29 : vector<8x1152xf32>
    %c5 = arith.constant 5 : index
    %c0_28 = arith.constant 0 : index
    %c0_29 = arith.constant 0 : index
    %31 = vector.load %arg2[%c5, %c0_28, %c0_29] : memref<9x8x4xbf16, #tpu.memory_space<vmem>>, vector<1x8x4xbf16>
    %32 = vector.shape_cast %31 : vector<1x8x4xbf16> to vector<8x4xbf16>
    %c0_30 = arith.constant 0 : index
    %c0_31 = arith.constant 0 : index
    %c36 = arith.constant 36 : index
    %33 = vector.load %arg1[%c0_30, %c0_31, %c36] : memref<1x4x1280xbf16, #tpu.memory_space<vmem>>, vector<1x4x1152xbf16>
    %34 = vector.shape_cast %33 : vector<1x4x1152xbf16> to vector<4x1152xbf16>
    %cst_32 = arith.constant dense<0.000000e+00> : vector<8x1152xf32>
    %35 = tpu.matmul %32, %34, %cst_32 {dimension_numbers = #tpu.dot_dimension_numbers<[1], [0], [0], [1], [0, 0, 1, 1], [], []>} : vector<8x4xbf16>, vector<4x1152xbf16>, vector<8x1152xf32> -> vector<8x1152xf32>
    %36 = arith.addf %30, %35 : vector<8x1152xf32>
    %c6 = arith.constant 6 : index
    %c0_33 = arith.constant 0 : index
    %c0_34 = arith.constant 0 : index
    %37 = vector.load %arg2[%c6, %c0_33, %c0_34] : memref<9x8x4xbf16, #tpu.memory_space<vmem>>, vector<1x8x4xbf16>
    %38 = vector.shape_cast %37 : vector<1x8x4xbf16> to vector<8x4xbf16>
    %c0_35 = arith.constant 0 : index
    %c0_36 = arith.constant 0 : index
    %c68 = arith.constant 68 : index
    %39 = vector.load %arg1[%c0_35, %c0_36, %c68] : memref<1x4x1280xbf16, #tpu.memory_space<vmem>>, vector<1x4x1152xbf16>
    %40 = vector.shape_cast %39 : vector<1x4x1152xbf16> to vector<4x1152xbf16>
    %cst_37 = arith.constant dense<0.000000e+00> : vector<8x1152xf32>
    %41 = tpu.matmul %38, %40, %cst_37 {dimension_numbers = #tpu.dot_dimension_numbers<[1], [0], [0], [1], [0, 0, 1, 1], [], []>} : vector<8x4xbf16>, vector<4x1152xbf16>, vector<8x1152xf32> -> vector<8x1152xf32>
    %42 = arith.addf %36, %41 : vector<8x1152xf32>
    %c7 = arith.constant 7 : index
    %c0_38 = arith.constant 0 : index
    %c0_39 = arith.constant 0 : index
    %43 = vector.load %arg2[%c7, %c0_38, %c0_39] : memref<9x8x4xbf16, #tpu.memory_space<vmem>>, vector<1x8x4xbf16>
    %44 = vector.shape_cast %43 : vector<1x8x4xbf16> to vector<8x4xbf16>
    %c0_40 = arith.constant 0 : index
    %c0_41 = arith.constant 0 : index
    %c69 = arith.constant 69 : index
    %45 = vector.load %arg1[%c0_40, %c0_41, %c69] : memref<1x4x1280xbf16, #tpu.memory_space<vmem>>, vector<1x4x1152xbf16>
    %46 = vector.shape_cast %45 : vector<1x4x1152xbf16> to vector<4x1152xbf16>
    %cst_42 = arith.constant dense<0.000000e+00> : vector<8x1152xf32>
    %47 = tpu.matmul %44, %46, %cst_42 {dimension_numbers = #tpu.dot_dimension_numbers<[1], [0], [0], [1], [0, 0, 1, 1], [], []>} : vector<8x4xbf16>, vector<4x1152xbf16>, vector<8x1152xf32> -> vector<8x1152xf32>
    %48 = arith.addf %42, %47 : vector<8x1152xf32>
    %c8 = arith.constant 8 : index
    %c0_43 = arith.constant 0 : index
    %c0_44 = arith.constant 0 : index
    %49 = vector.load %arg2[%c8, %c0_43, %c0_44] : memref<9x8x4xbf16, #tpu.memory_space<vmem>>, vector<1x8x4xbf16>
    %50 = vector.shape_cast %49 : vector<1x8x4xbf16> to vector<8x4xbf16>
    %c0_45 = arith.constant 0 : index
    %c0_46 = arith.constant 0 : index
    %c70 = arith.constant 70 : index
    %51 = vector.load %arg1[%c0_45, %c0_46, %c70] : memref<1x4x1280xbf16, #tpu.memory_space<vmem>>, vector<1x4x1152xbf16>
    %52 = vector.shape_cast %51 : vector<1x4x1152xbf16> to vector<4x1152xbf16>
    %cst_47 = arith.constant dense<0.000000e+00> : vector<8x1152xf32>
    %53 = tpu.matmul %50, %52, %cst_47 {dimension_numbers = #tpu.dot_dimension_numbers<[1], [0], [0], [1], [0, 0, 1, 1], [], []>} : vector<8x4xbf16>, vector<4x1152xbf16>, vector<8x1152xf32> -> vector<8x1152xf32>
    %54 = arith.addf %48, %53 : vector<8x1152xf32>
    %c0_48 = arith.constant 0 : index
    %c0_49 = arith.constant 0 : index
    %55 = vector.load %arg3[%c0_48, %c0_49] : memref<8x1xf32, #tpu.memory_space<vmem>>, vector<8x1xf32>
    %56 = vector.broadcast %55 : vector<8x1xf32> to vector<8x1152xf32>
    %57 = arith.addf %54, %56 : vector<8x1152xf32>
    %58 = vector.shape_cast %57 : vector<8x1152xf32> to vector<1x8x1152xf32>
    %c0_50 = arith.constant 0 : index
    %c0_51 = arith.constant 0 : index
    %c0_52 = arith.constant 0 : index
    %59 = vector.load %arg4[%c0_50, %c0_51, %c0_52] : memref<1x8x1152xf32, #tpu.memory_space<vmem>>, vector<1x8x1152xf32>
    tpu.vector_store %arg4[%c0_50, %c0_51, %c0_52], %58 {strides = array<i32>} : memref<1x8x1152xf32, #tpu.memory_space<vmem>>, vector<1x8x1152xf32>,
    return
  }
  func.func @transform_0(%arg0: i32) -> (i32, i32, i32) {
    %c0_i32 = arith.constant 0 : i32
    %c0_i32_0 = arith.constant 0 : i32
    %c0_i32_1 = arith.constant 0 : i32
    return %arg0, %c0_i32, %c0_i32_0 : i32, i32, i32
  }
  func.func @transform_1(%arg0: i32) -> (i32, i32, i32) {
    %c0_i32 = arith.constant 0 : i32
    %c0_i32_0 = arith.constant 0 : i32
    %c0_i32_1 = arith.constant 0 : i32
    %c0_i32_2 = arith.constant 0 : i32
    return %c0_i32, %c0_i32_0, %c0_i32_1 : i32, i32, i32
  }
  func.func @transform_2(%arg0: i32) -> (i32, i32) {
    %c0_i32 = arith.constant 0 : i32
    %c0_i32_0 = arith.constant 0 : i32
    %c0_i32_1 = arith.constant 0 : i32
    return %c0_i32, %c0_i32_0 : i32, i32
  }
  func.func @transform_3(%arg0: i32) -> (i32, i32, i32) {
    %c0_i32 = arith.constant 0 : i32
    %c0_i32_0 = arith.constant 0 : i32
    %c0_i32_1 = arith.constant 0 : i32
    return %arg0, %c0_i32, %c0_i32_0 : i32, i32, i32
  }
}

</mosaic_0001>

<bundles_post_ra>
// kernel: tpu_custom_call.1
= control target key start
LH: loop header
LB: loop body
LE: loop exit
PB: predicated region body
PF: predicated region fallthrough
CT: control target
= control target key end

     0   :  { %8 = vsyncpa [#allocation3], 0  ;;  %s4011_s0 = inlined_call_operand.vmem [shape: bf16[2,4,1280], index: 0, kind: input, shape index: {}]   ;;  %s4012_s1 = inlined_call_operand.vmem [shape: bf16[9,8,4], index: 1, kind: input, shape index: {}]   ;;  %s4013_s2 = inlined_call_operand.vmem [shape: f32[8,1], index: 2, kind: input, shape index: {}]   ;;  %s4014_s3 = inlined_call_operand.hbm [shape: f32[2,8,1152], index: 3, kind: output, shape index: {}]  }
   0x1   :  { %10 = vsyncpa [#allocation3 + $0x1], 0  ;;  %s3459_s12 = smov 0   ;;  %s3461_s13 = smov 0  }
   0x2   :  { %s3463_s14 = smov 0   ;;  %s3465_s15 = smov 0  }
   0x3 LB: > { %s3480_s16 = sadd.s32 4294967295, %s3424_s15   ;;  %s3127_s17 = sadd.s32 4294967294, %s3424_s15   ;;  %s3424_s15 = sphi %s3465_s15, %s4020_s15   ;;  %s3420_s14 = sphi %s3463_s14, %s4019_s14   ;;  %s3416_s13 = sphi %s3461_s13, %s4018_s13   ;;  %s3412_s12 = sphi %s3459_s12, %s4017_s12  }
   0x4   : > { %s3484_s18 = sadd.s32 1, %s3424_s15   ;;  %s91_s19 = sadd.s32 1, %s3420_s14 }
   0x5   : > { %s88_s20 = ssub.s32 %s3424_s15, %s3484_s18  ;;  %p101_p0 = scmp.ne.s32.totalorder %s3420_s14, %s3416_s13 }
   0x6   : > { %p89_p1 = scmp.eq.s32.totalorder %s88_s20, 0  ;;  %p102_p2 = scmp.eq.s32.totalorder %s3480_s16, 1 }
   0x7   : > { %p107_p3 = scmp.ne.s32.totalorder %s3416_s13, %s3412_s12  ;;  %p108_p4 = scmp.eq.s32.totalorder %s3127_s17, 1 }
   0x8   : > { %s3495_s21 = scalar_select %p89_p1, %s3420_s14, %s91_s19  }
   0x9   : > { %p3497_p5 = por %p102_p2, %p101_p0  ;;  %p3501_p6 = por %p108_p4, %p107_p3 }
   0xa   : > { %p3130_p7 = scmp.ge.s32.totalorder %s3424_s15, 1  ;;  %p140_p8 = scmp.lt.s32.totalorder %s3424_s15, 3 }
   0xc   : > { %p141_p9 = pnand %p3130_p7, %p140_p8 }
   0xd   : > { %p164_p10 = scmp.lt.s32.totalorder (!%p141_p9), %s3480_s16, 1  ;;  %v186_v0 = vlaneseq (!%p141_p9)  ;;  %v3426_v1 = vmov (!%p141_p9), 1983009808   ;;  %v3427_v6 = vmov (!%p141_p9), 0   ;;  %s3428_s29 = smov (!%p141_p9), 127   ;;  %vm244_vm0 = vcmask (!%p141_p9), 1039360  }
   0xe   : > { %144 = sbr.rel (%p141_p9) target bundleno = 559 (0x22f), region = 32  ;;  %v184_v2 = vunpack.c.l.s4 (!%p141_p9), %v3426_v1  ;;  %318 = vmatprep.mubr.bf16.mxu0 (!%p141_p9), %v3427_v6  ;;  %359 = vmatprep.mubr.bf16.mxu1 (!%p141_p9), %v3427_v6  ;;  %s3429_s30 = smov (!%p141_p9), 126   ;;  %vm258_vm1 = vcmask (!%p141_p9), 1041408   ;;  %v3132_v28 = vld [vmem:[%s4012_s1 + $0x4] sm:$0xf] (!%p141_p9)  ;;  %vm254_vm2 = vcmask (!%p141_p9), 31744  }
   0xf   : > { %v187_v3 = vshrl.u32 (!%p141_p9), %v186_v0, 7  ;;  %3359 = vset.pattern.permute.xlu0 (!%p141_p9), %v3427_v6  ;;  %s3430_s4 = smov (!%p141_p9), 94   ;;  %s3431_s5 = smov (!%p141_p9), 93   ;;  %v3435_v41 = vmov (!%p141_p9), 0.0   ;;  %vm3436_vm3 = vmmov (!%p141_p9), 0   ;;  %vm838_vm4 = vcmask (!%p141_p9), 1031168  }
  0x10   : > { %v185_v4 = vunpack.c.0.s8 (!%p141_p9), %v184_v2  ;;  %s3432_s6 = smov (!%p141_p9), 92   ;;  %s3433_s7 = smov (!%p141_p9), 60   ;;  %v170_v53 = vld [vmem:[%s4012_s1] sm:$0xf] (!%p141_p9)  ;;  %vm1161_vm5 = vcmask (!%p141_p9), 769024   ;;  %vm1484_vm6 = vcmask (!%p141_p9), 760832  }
  0x11   : > { %s3434_s8 = smov (!%p141_p9), 59   ;;  %s3437_s19 = smov (!%p141_p9), 58   ;;  %vm1807_vm7 = vcmask (!%p141_p9), 752640   ;;  %vm2130_vm8 = vcmask (!%p141_p9), 490496   ;;  %vm2453_vm9 = vcmask (!%p141_p9), 482304   ;;  %vm2776_vm10 = vcmask (!%p141_p9), 474112  }
  0x12   : > { %v188_v5 = vsub.s32 (!%p141_p9), %v185_v4, %v187_v3  ;;  %s161_s17 = sand.u32 (!%p141_p9), 1, %s3416_s13  }
  0x15   : > { %s165_s24 = scalar_select %p164_p10, %s3480_s16, 1 }
  0x17   : > { %s3306_s25 = smul.u32 20, %s165_s24 }
  0x18   : > { %s3307_s24 = smul.u32 1152, %s3480_s16  ;;  %s3054_s16 = scalar_lea.sflag [#allocation3], %s161_s17 }
  0x19   : > { %s3514_s28 = scalar_lea.vmem %s4011_s0, %s3306_s25 }
  0x1a   : > { %v176_v7 = vld [vmem:[%s3514_s28] sm:$0xff]  ;;  %v177_v10 = vld [vmem:[%s3514_s28 + $0x8] sm:$0xff]  ;;  %v3550_v19 = vld.sshfl [vmem:[%s3514_s28 + $0x10] sm:$0x33 pattern:$0x76325410] }
  0x1b   : > { %v3518_v8 = vrot.slane %v176_v7, %v188_v5  ;;  %v182_v9 = vcombine.high %v176_v7, %v176_v7  ;;  %v3533_v14 = vrot.slane %v177_v10, %v188_v5  ;;  %v199_v15 = vcombine.high %v177_v10, %v177_v10  ;;  %v3143_v60 = vld.sshfl [vmem:[%s3514_s28 + $0x10] sm:$0x3 pattern:$0x76325410]  ;;  %s3966_s28 = scalar_lea.hbm %s4014_s3, %s3307_s24 }
  0x1c   : > { %v3556_v20 = vcombine.high %v3550_v19, %v3550_v19  ;;  %v562_v62 = vsel %vm258_vm1, %v3143_v60, 0 }
  0x1d   : > { %224 = vrot.lane.b32.xlu0 %v3518_v8, %s3428_s29  ;;  %v3524_v11 = vcombine.high %v3518_v8, %v3518_v8  ;;  %v3526_v12 = vrot.slane %v182_v9, %v188_v5  ;;  %v3539_v16 = vcombine.high %v3533_v14, %v3533_v14  ;;  %v3541_v17 = vrot.slane %v199_v15, %v188_v5 }
  0x1e   : > { %v538_v47 = vsel %vm258_vm1, %v3518_v8, 0  ;;  %v550_v54 = vsel %vm258_vm1, %v3533_v14, 0 }
  0x1f   : > { %228 = vrot.lane.b32.xlu1 %v3526_v12, %s3428_s29  ;;  %v3531_v13 = vcombine.high %v3526_v12, %v3526_v12  ;;  %v3547_v18 = vcombine.high %v3541_v17, %v3541_v17  ;;  %v544_v50 = vsel %vm258_vm1, %v3526_v12, 0  ;;  %v556_v57 = vsel %vm258_vm1, %v3541_v17, 0 }
  0x21   : > { %226 = vrot.lane.b32.xlu0 %v3524_v11, %s3428_s29 }
  0x23   : > { %230 = vrot.lane.b32.xlu1 %v3531_v13, %s3428_s29 }
  0x25   : > { %232 = vrot.lane.b32.xlu0 %v3533_v14, %s3428_s29 }
  0x27   : > { %234 = vrot.lane.b32.xlu1 %v3539_v16, %s3428_s29 }
  0x29   : > { %236 = vrot.lane.b32.xlu0 %v3541_v17, %s3428_s29 }
  0x2b   : > { %238 = vrot.lane.b32.xlu1 %v3547_v18, %s3428_s29 }
  0x2d   : > { %240 = vrot.lane.b32.xlu0 %v3550_v19, %s3428_s29 }
  0x2f   : > { %242 = vrot.lane.b32.xlu1 %v3556_v20, %s3428_s29 }
  0x31   : > { %818 = vrot.lane.b32.xlu0 %v3518_v8, %s3429_s30 }
  0x33   : > { %820 = vrot.lane.b32.xlu1 %v3524_v11, %s3429_s30 }
  0x35   : > { %822 = vrot.lane.b32.xlu0 %v3526_v12, %s3429_s30 }
  0x37   : > { %824 = vrot.lane.b32.xlu1 %v3531_v13, %s3429_s30 }
  0x39   : > { %826 = vrot.lane.b32.xlu0 %v3533_v14, %s3429_s30 }
  0x3b   : > { %828 = vrot.lane.b32.xlu1 %v3539_v16, %s3429_s30 }
  0x3d   : > { %830 = vrot.lane.b32.xlu0 %v3541_v17, %s3429_s30 }
  0x3f   : > { %832 = vrot.lane.b32.xlu1 %v3547_v18, %s3429_s30 }
  0x41   : > { %834 = vrot.lane.b32.xlu0 %v3550_v19, %s3429_s30 }
  0x43   : > { %836 = vrot.lane.b32.xlu1 %v3556_v20, %s3429_s30  ;;  %s3438_s30 = smov [#allocation2]  }
  0x45   : > { %1141 = vrot.lane.b32.xlu0 %v3518_v8, %s3430_s4 }
  0x47   : > { %1143 = vrot.lane.b32.xlu1 %v3524_v11, %s3430_s4 }
  0x49   : > { %1145 = vrot.lane.b32.xlu0 %v3526_v12, %s3430_s4 }
  0x4b   : > { %1147 = vrot.lane.b32.xlu1 %v3531_v13, %s3430_s4 }
  0x4d   : > { %1149 = vrot.lane.b32.xlu0 %v3533_v14, %s3430_s4 }
  0x4f   : > { %1151 = vrot.lane.b32.xlu1 %v3539_v16, %s3430_s4 }
  0x51   : > { %1153 = vrot.lane.b32.xlu0 %v3541_v17, %s3430_s4 }
  0x53   : > { %1155 = vrot.lane.b32.xlu1 %v3547_v18, %s3430_s4 }
  0x55   : > { %1157 = vrot.lane.b32.xlu0 %v3550_v19, %s3430_s4 }
  0x57   : > { %1159 = vrot.lane.b32.xlu1 %v3556_v20, %s3430_s4  ;;  %s3366_s4 = sshll.u32 %s3438_s30, 4  ;;  %s3367_s4 = int_to_ptr.vmem [resolvable:$false] %s3366_s4 }
  0x59   : > { %1464 = vrot.lane.b32.xlu0 %v3518_v8, %s3431_s5 }
  0x5b   : > { %1466 = vrot.lane.b32.xlu1 %v3524_v11, %s3431_s5 }
  0x5d   : > { %1468 = vrot.lane.b32.xlu0 %v3526_v12, %s3431_s5 }
  0x5f   : > { %1470 = vrot.lane.b32.xlu1 %v3531_v13, %s3431_s5 }
  0x61   : > { %1472 = vrot.lane.b32.xlu0 %v3533_v14, %s3431_s5 }
  0x63   : > { %1474 = vrot.lane.b32.xlu1 %v3539_v16, %s3431_s5 }
  0x65   : > { %1476 = vrot.lane.b32.xlu0 %v3541_v17, %s3431_s5 }
  0x67   : > { %1478 = vrot.lane.b32.xlu1 %v3547_v18, %s3431_s5 }
  0x69   : > { %1480 = vrot.lane.b32.xlu0 %v3550_v19, %s3431_s5 }
  0x6b   : > { %1482 = vrot.lane.b32.xlu1 %v3556_v20, %s3431_s5  ;;  %s3368_s5 = scalar_lea.vmem %s3367_s4, 2304 }
  0x6d   : > { %1787 = vrot.lane.b32.xlu0 %v3518_v8, %s3432_s6 }
  0x6f   : > { %1789 = vrot.lane.b32.xlu1 %v3524_v11, %s3432_s6 }
  0x71   : > { %1791 = vrot.lane.b32.xlu0 %v3526_v12, %s3432_s6 }
  0x73   : > { %1793 = vrot.lane.b32.xlu1 %v3531_v13, %s3432_s6 }
  0x75   : > { %1795 = vrot.lane.b32.xlu0 %v3533_v14, %s3432_s6 }
  0x77   : > { %1797 = vrot.lane.b32.xlu1 %v3539_v16, %s3432_s6 }
  0x79   : > { %1799 = vrot.lane.b32.xlu0 %v3541_v17, %s3432_s6 }
  0x7b   : > { %1801 = vrot.lane.b32.xlu1 %v3547_v18, %s3432_s6 }
  0x7d   : > { %1803 = vrot.lane.b32.xlu0 %v3550_v19, %s3432_s6 }
  0x7f   : > { %1805 = vrot.lane.b32.xlu1 %v3556_v20, %s3432_s6 }
  0x81   : > { %2110 = vrot.lane.b32.xlu0 %v3518_v8, %s3433_s7 }
  0x83   : > { %2112 = vrot.lane.b32.xlu1 %v3524_v11, %s3433_s7 }
  0x85   : > { %2114 = vrot.lane.b32.xlu0 %v3526_v12, %s3433_s7 }
  0x87   : > { %2116 = vrot.lane.b32.xlu1 %v3531_v13, %s3433_s7 }
  0x89   : > { %2118 = vrot.lane.b32.xlu0 %v3533_v14, %s3433_s7 }
  0x8b   : > { %2120 = vrot.lane.b32.xlu1 %v3539_v16, %s3433_s7 }
  0x8d   : > { %2122 = vrot.lane.b32.xlu0 %v3541_v17, %s3433_s7 }
  0x8f   : > { %v225_v21 = vpop.permute.xlu0 %224  ;;  %2124 = vrot.lane.b32.xlu1 %v3547_v18, %s3433_s7 }
  0x91   : > { %v229_v22 = vpop.permute.xlu1 %228  ;;  %2126 = vrot.lane.b32.xlu0 %v3550_v19, %s3433_s7 }
  0x93   : > { %v227_v23 = vpop.permute.xlu0 %226  ;;  %2128 = vrot.lane.b32.xlu1 %v3556_v20, %s3433_s7 }
  0x94   : > { %v246_v24 = vsel %vm244_vm0, %v227_v23, %v229_v22  ;;  %v245_v25 = vsel %vm244_vm0, %v225_v21, %v227_v23 }
  0x95   : > { %3134 = vmatprep.subr.msk.bf16.mxu0 %vm258_vm1, %v246_v24  ;;  %v231_v26 = vpop.permute.xlu1 %230  ;;  %v260_v27 = vsel %vm258_vm1, %v245_v25, 0  ;;  %2433 = vrot.lane.b32.xlu0 %v3518_v8, %s3434_s8 }
  0x96   : > { %287 = vmatpush1.bf16.msra.mxu0 %v260_v27  ;;  %v247_v29 = vsel %vm244_vm0, %v229_v22, %v231_v26 }
  0x97   : > { %v233_v30 = vpop.permute.xlu0 %232  ;;  %2435 = vrot.lane.b32.xlu1 %v3524_v11, %s3434_s8  ;;  %v266_v33 = vsel %vm258_vm1, %v247_v29, 0 }
  0x98   : > { %v248_v31 = vsel %vm244_vm0, %v231_v26, %v233_v30 }
  0x99   : > { %3135 = vmatmul.mubr.msk.bf16.vlgmr.msra.gmra.mrb[0].mxu0 %vm254_vm2, %v3132_v28  ;;  %3136 = vmatprep.subr.msk.bf16.mxu1 %vm258_vm1, %v248_v31  ;;  %v235_v32 = vpop.permute.xlu1 %234 }
  0x9a   : > { %v249_v34 = vsel %vm244_vm0, %v233_v30, %v235_v32  ;;  %328 = vmatpush1.bf16.msra.mxu1 %v266_v33  ;;  %400 = vmatprep.mubr.bf16.mxu0 %v3427_v6 }
  0x9b   : > { %v237_v35 = vpop.permute.xlu0 %236  ;;  %2437 = vrot.lane.b32.xlu0 %v3526_v12, %s3434_s8  ;;  %2439 = vrot.lane.b32.xlu1 %v3531_v13, %s3434_s8  ;;  %v272_v37 = vsel %vm258_vm1, %v249_v34, 0 }
  0x9c   : > { %v250_v36 = vsel %vm244_vm0, %v235_v32, %v237_v35 }
  0x9d   : > { %3137 = vmatmul.mubr.msk.bf16.vlgmr.msra.gmra.mrb[0].mxu1 %vm254_vm2, %v3132_v28  ;;  %3138 = vmatprep.subr.msk.bf16.mxu0 %vm258_vm1, %v250_v36  ;;  %v239_v38 = vpop.permute.xlu1 %238 }
  0x9e   : > { %v251_v39 = vsel %vm244_vm0, %v237_v35, %v239_v38  ;;  %369 = vmatpush1.bf16.msra.mxu0 %v272_v37  ;;  %441 = vmatprep.mubr.bf16.mxu1 %v3427_v6 }
  0x9f   : > { %v241_v40 = vpop.permute.xlu0 %240  ;;  %3251 = vmatprep.subr.bf16.mxu0 %v3435_v41  ;;  %2441 = vrot.lane.b32.xlu0 %v3533_v14, %s3434_s8  ;;  %v278_v43 = vsel %vm258_vm1, %v251_v39, 0  ;;  %v3164_v39 = vld [vmem:[%s4012_s1 + $0xc] sm:$0xf] }
  0xa0   : > { %v252_v42 = vsel %vm244_vm0, %v239_v38, %v241_v40  ;;  %2443 = vrot.lane.b32.xlu1 %v3539_v16, %s3434_s8 }
  0xa1   : > { %3139 = vmatmul.mubr.msk.bf16.vlgmr.msra.gmra.mrb[4].mxu0 %vm254_vm2, %v3132_v28  ;;  %3140 = vmatprep.subr.msk.bf16.mxu1 %vm258_vm1, %v252_v42  ;;  %v243_v44 = vpop.permute.xlu1 %242 }
  0xa2   : > { %410 = vmatpush1.bf16.msra.mxu1 %v278_v43  ;;  %v253_v45 = vsel %vm244_vm0, %v241_v40, %v243_v44  ;;  %3253 = vmatprep.mubr.msk.bf16.mxu0 %vm3436_vm3, %v3435_v41 }
  0xa3   : > { %v284_v46 = vsel %vm258_vm1, %v253_v45, 0  ;;  %3144 = vmatprep.subr.msk.bf16.mxu1 %vm258_vm1, %v3524_v11  ;;  %2445 = vrot.lane.b32.xlu0 %v3541_v17, %s3434_s8  ;;  %v819_v48 = vpop.permute.xlu0 %818 }
  0xa4   : > { %3252 = vmatpush3.bf16.msra.mxu0 %v284_v46  ;;  %2447 = vrot.lane.b32.xlu1 %v3547_v18, %s3434_s8 }
  0xa5   : > { %3141 = vmatmul.mubr.msk.bf16.vlgmr.msra.gmra.mrb[4].mxu1 %vm254_vm2, %v3132_v28  ;;  %3146 = vmatprep.subr.msk.bf16.mxu0 %vm258_vm1, %v3531_v13  ;;  %v821_v49 = vpop.permute.xlu1 %820 }
  0xa6   : > { %565 = vmatpush1.bf16.msra.mxu1 %v538_v47  ;;  %596 = vmatprep.mubr.bf16.mxu1 %v3427_v6  ;;  %v839_v0 = vsel %vm838_vm4, %v819_v48, %v821_v49 }
  0xa7   : > { %3148 = vmatprep.subr.msk.bf16.mxu1 %vm258_vm1, %v3539_v16  ;;  %2449 = vrot.lane.b32.xlu0 %v3550_v19, %s3434_s8  ;;  %v823_v51 = vpop.permute.xlu0 %822  ;;  %v852_v3 = vsel %vm258_vm1, %v839_v0, 0 }
  0xa8   : > { %2451 = vrot.lane.b32.xlu1 %v3556_v20, %s3434_s8  ;;  %v840_v59 = vsel %vm838_vm4, %v821_v49, %v823_v51 }
  0xa9   : > { %3254 = vmatmul.mubr.msk.bf16.vlgmr.msra.gmra.mrb[8].mxu0 %vm254_vm2, %v3132_v28  ;;  %v825_v52 = vpop.permute.xlu1 %824 }
  0xaa   : > { %606 = vmatpush1.bf16.msra.mxu0 %v544_v50  ;;  %637 = vmatprep.mubr.bf16.mxu0 %v3427_v6  ;;  %v841_v5 = vsel %vm838_vm4, %v823_v51, %v825_v52 }
  0xab   : > { %3150 = vmatprep.subr.msk.bf16.mxu0 %vm258_vm1, %v3547_v18  ;;  %2756 = vrot.lane.b32.xlu0 %v3518_v8, %s3437_s19  ;;  %v827_v55 = vpop.permute.xlu0 %826  ;;  %v858_v9 = vsel %vm258_vm1, %v841_v5, 0 }
  0xac   : > { %2758 = vrot.lane.b32.xlu1 %v3524_v11, %s3437_s19  ;;  %v842_v1 = vsel %vm838_vm4, %v825_v52, %v827_v55 }
  0xad   : > { %3145 = vmatmul.mubr.msk.bf16.vlgmr.msra.gmra.mrb[8].mxu1 %vm254_vm2, %v170_v53  ;;  %v829_v56 = vpop.permute.xlu1 %828 }
  0xae   : > { %647 = vmatpush1.bf16.msra.mxu1 %v550_v54  ;;  %678 = vmatprep.mubr.bf16.mxu1 %v3427_v6  ;;  %v843_v11 = vsel %vm838_vm4, %v827_v55, %v829_v56 }
  0xaf   : > { %3257 = vmatprep.subr.bf16.mxu1 %v3435_v41  ;;  %2760 = vrot.lane.b32.xlu0 %v3526_v12, %s3437_s19  ;;  %v831_v58 = vpop.permute.xlu0 %830  ;;  %v864_v15 = vsel %vm258_vm1, %v843_v11, 0 }
  0xb0   : > { %2762 = vrot.lane.b32.xlu1 %v3531_v13, %s3437_s19  ;;  %v844_v7 = vsel %vm838_vm4, %v829_v56, %v831_v58 }
  0xb1   : > { %3147 = vmatmul.mubr.msk.bf16.vlgmr.msra.gmra.mrb[12].mxu0 %vm254_vm2, %v170_v53  ;;  %v833_v61 = vpop.permute.xlu1 %832 }
  0xb2   : > { %688 = vmatpush1.bf16.msra.mxu0 %v556_v57  ;;  %719 = vmatprep.mubr.bf16.mxu0 %v3427_v6 }
  0xb3   : > { %3155 = vmatprep.subr.msk.bf16.mxu0 %vm258_vm1, %v840_v59  ;;  %2764 = vrot.lane.b32.xlu0 %v3533_v14, %s3437_s19  ;;  %v835_v63 = vpop.permute.xlu0 %834  ;;  %v3153_v14 = vld [vmem:[%s4012_s1 + $0x8] sm:$0xf] }
  0xb4   : > { %2766 = vrot.lane.b32.xlu1 %v3539_v16, %s3437_s19  ;;  %v846_v12 = vsel %vm838_vm4, %v833_v61, %v835_v63 }
  0xb5   : > { %3149 = vmatmul.mubr.msk.bf16.vlgmr.msra.gmra.mrb[12].mxu1 %vm254_vm2, %v170_v53  ;;  %v837_v2 = vpop.permute.xlu1 %836 }
  0xb6   : > { %3258 = vmatpush3.bf16.msra.mxu1 %v562_v62  ;;  %3259 = vmatprep.mubr.msk.bf16.mxu1 %vm3436_vm3, %v3435_v41  ;;  %v847_v21 = vsel %vm838_vm4, %v835_v63, %v837_v2 }
  0xb7   : > { %3157 = vmatprep.subr.msk.bf16.mxu1 %vm258_vm1, %v842_v1  ;;  %2768 = vrot.lane.b32.xlu0 %v3541_v17, %s3437_s19  ;;  %v1142_v4 = vpop.permute.xlu0 %1141  ;;  %v845_v17 = vsel %vm838_vm4, %v831_v58, %v833_v61  ;;  %v876_v24 = vsel %vm258_vm1, %v847_v21, 0  ;;  %v3175_v1 = vld [vmem:[%s4012_s1 + $0x10] sm:$0xf] }
  0xb8   : > { %2770 = vrot.lane.b32.xlu1 %v3547_v18, %s3437_s19 }
  0xb9   : > { %3151 = vmatmul.mubr.msk.bf16.vlgmr.msra.gmra.mrb[16].mxu0 %vm254_vm2, %v170_v53  ;;  %v1144_v8 = vpop.permute.xlu1 %1143 }
  0xba   : > { %879 = vmatpush1.bf16.msra.mxu0 %v852_v3  ;;  %910 = vmatprep.mubr.bf16.mxu0 %v3427_v6  ;;  %v1162_v26 = vsel %vm1161_vm5, %v1142_v4, %v1144_v8 }
  0xbb   : > { %3159 = vmatprep.subr.msk.bf16.mxu0 %vm258_vm1, %v844_v7  ;;  %2772 = vrot.lane.b32.xlu0 %v3550_v19, %s3437_s19  ;;  %v1146_v10 = vpop.permute.xlu0 %1145  ;;  %v870_v19 = vsel %vm258_vm1, %v845_v17, 0  ;;  %v1175_v29 = vsel %vm258_vm1, %v1162_v26, 0 }
  0xbc   : > { %2774 = vrot.lane.b32.xlu1 %v3556_v20, %s3437_s19  ;;  %v1163_v22 = vsel %vm1161_vm5, %v1144_v8, %v1146_v10  ;;  %s3305_s19 = smul.u32 72, %s161_s17 }
  0xbd   : > { %3260 = vmatmul.mubr.msk.bf16.vlgmr.msra.gmra.mrb[16].mxu1 %vm254_vm2, %v170_v53  ;;  %v1148_v13 = vpop.permute.xlu1 %1147 }
  0xbe   : > { %920 = vmatpush1.bf16.msra.mxu1 %v858_v9  ;;  %951 = vmatprep.mubr.bf16.mxu1 %v3427_v6  ;;  %v1164_v31 = vsel %vm1161_vm5, %v1146_v10, %v1148_v13  ;;  %s3951_s20 = scalar_lea.vmem [#allocation2], %s3305_s19 }
  0xbf   : > { %3161 = vmatprep.subr.msk.bf16.mxu1 %vm258_vm1, %v846_v12  ;;  %v1150_v16 = vpop.permute.xlu0 %1149  ;;  %v1181_v34 = vsel %vm258_vm1, %v1164_v31, 0  ;;  %s3068_s25 = sshll.u32 %s3951_s20, 4  ;;  %s3968_s25 = int_to_ptr.vmem [resolvable:$true] %s3068_s25 }
  0xc0   : > { %v1165_v27 = vsel %vm1161_vm5, %v1148_v13, %v1150_v16  ;;  %s3362_s29 = scalar_lea.vmem %s3968_s25, 1152  ;;  %p3369_p0 = scmp.lt.s32.totalorder %s3968_s25, %s3367_s4 }
  0xc1   : > { %3156 = vmatmul.mubr.msk.bf16.vlgmr.msra.gmra.mrb[20].mxu0 %vm254_vm2, %v3153_v14  ;;  %v1152_v18 = vpop.permute.xlu1 %1151  ;;  %p3363_p11 = scmp.ne.s32.totalorder %s3968_s25, %s3362_s29  ;;  %p3370_p1 = scmp.lt.s32.totalorder %s3368_s5, %s3362_s29 }
  0xc2   : > { %961 = vmatpush1.bf16.msra.mxu0 %v864_v15  ;;  %992 = vmatprep.mubr.bf16.mxu0 %v3427_v6  ;;  %v1166_v36 = vsel %vm1161_vm5, %v1150_v16, %v1152_v18 }
  0xc3   : > { %3263 = vmatprep.subr.bf16.mxu0 %v3435_v41  ;;  %v1154_v20 = vpop.permute.xlu0 %1153  ;;  %v1187_v40 = vsel %vm258_vm1, %v1166_v36, 0  ;;  %p3364_p12 = pnand %p3363_p11, %p3497_p5  ;;  %p3371_p2 = por %p3370_p1, %p3369_p0 }
  0xc4   : > { %v1167_v32 = vsel %vm1161_vm5, %v1152_v18, %v1154_v20 }
  0xc5   : > { %3158 = vmatmul.mubr.msk.bf16.vlgmr.msra.gmra.mrb[20].mxu1 %vm254_vm2, %v3153_v14  ;;  %v1156_v23 = vpop.permute.xlu1 %1155  ;;  %p3365_p13 = pneg %p3364_p12 }
  0xc6   : > { %1002 = vmatpush1.bf16.msra.mxu1 %v870_v19  ;;  %1033 = vmatprep.mubr.bf16.mxu1 %v3427_v6  ;;  %v1168_v43 = vsel %vm1161_vm5, %v1154_v20, %v1156_v23 }
  0xc7   : > { %3166 = vmatprep.subr.msk.bf16.mxu1 %vm258_vm1, %v1163_v22  ;;  %v1158_v25 = vpop.permute.xlu0 %1157  ;;  %v1193_v45 = vsel %vm258_vm1, %v1168_v43, 0  ;;  %p3372_p3 = pnand %p3371_p2, %p3365_p13 }
  0xc8   : > { %v1169_v37 = vsel %vm1161_vm5, %v1156_v23, %v1158_v25 }
  0xc9   : > { %3160 = vmatmul.mubr.msk.bf16.vlgmr.msra.gmra.mrb[24].mxu0 %vm254_vm2, %v3153_v14  ;;  %v1160_v28 = vpop.permute.xlu1 %1159 }
  0xca   : > { %3264 = vmatpush3.bf16.msra.mxu0 %v876_v24  ;;  %3265 = vmatprep.mubr.msk.bf16.mxu0 %vm3436_vm3, %v3435_v41  ;;  %v1170_v47 = vsel %vm1161_vm5, %v1158_v25, %v1160_v28 }
  0xcb   : > { %3168 = vmatprep.subr.msk.bf16.mxu0 %vm258_vm1, %v1165_v27  ;;  %v1465_v30 = vpop.permute.xlu0 %1464  ;;  %v1199_v50 = vsel %vm258_vm1, %v1170_v47, 0  ;;  %v3186_v27 = vld [vmem:[%s4012_s1 + $0x14] sm:$0xf] }
  0xcd   : > { %3162 = vmatmul.mubr.msk.bf16.vlgmr.msra.gmra.mrb[24].mxu1 %vm254_vm2, %v3153_v14  ;;  %v1467_v33 = vpop.permute.xlu1 %1466 }
  0xce   : > { %1202 = vmatpush1.bf16.msra.mxu1 %v1175_v29  ;;  %1233 = vmatprep.mubr.bf16.mxu1 %v3427_v6  ;;  %v1485_v52 = vsel %vm1484_vm6, %v1465_v30, %v1467_v33 }
  0xcf   : > { %3170 = vmatprep.subr.msk.bf16.mxu1 %vm258_vm1, %v1167_v32  ;;  %v1469_v35 = vpop.permute.xlu0 %1468  ;;  %v1498_v55 = vsel %vm258_vm1, %v1485_v52, 0 }
  0xd0   : > { %v1486_v48 = vsel %vm1484_vm6, %v1467_v33, %v1469_v35 }
  0xd1   : > { %3266 = vmatmul.mubr.msk.bf16.vlgmr.msra.gmra.mrb[28].mxu0 %vm254_vm2, %v3153_v14  ;;  %v1471_v38 = vpop.permute.xlu1 %1470 }
  0xd2   : > { %1243 = vmatpush1.bf16.msra.mxu0 %v1181_v34  ;;  %1274 = vmatprep.mubr.bf16.mxu0 %v3427_v6  ;;  %v1487_v57 = vsel %vm1484_vm6, %v1469_v35, %v1471_v38 }
  0xd3   : > { %3172 = vmatprep.subr.msk.bf16.mxu0 %vm258_vm1, %v1169_v37  ;;  %v1473_v42 = vpop.permute.xlu0 %1472  ;;  %v1504_v60 = vsel %vm258_vm1, %v1487_v57, 0 }
  0xd4   : > { %v1488_v53 = vsel %vm1484_vm6, %v1471_v38, %v1473_v42 }
  0xd5   : > { %3167 = vmatmul.mubr.msk.bf16.vlgmr.msra.gmra.mrb[28].mxu1 %vm254_vm2, %v3164_v39  ;;  %v1475_v44 = vpop.permute.xlu1 %1474 }
  0xd6   : > { %1284 = vmatpush1.bf16.msra.mxu1 %v1187_v40  ;;  %1315 = vmatprep.mubr.bf16.mxu1 %v3427_v6  ;;  %v1489_v62 = vsel %vm1484_vm6, %v1473_v42, %v1475_v44 }
  0xd7   : > { %3269 = vmatprep.subr.bf16.mxu1 %v3435_v41  ;;  %v1477_v46 = vpop.permute.xlu0 %1476  ;;  %v1510_v2 = vsel %vm258_vm1, %v1489_v62, 0 }
  0xd8   : > { %v1490_v58 = vsel %vm1484_vm6, %v1475_v44, %v1477_v46 }
  0xd9   : > { %3169 = vmatmul.mubr.msk.bf16.vlgmr.msra.gmra.mrb[32].mxu0 %vm254_vm2, %v3164_v39  ;;  %v1479_v49 = vpop.permute.xlu1 %1478 }
  0xda   : > { %1325 = vmatpush1.bf16.msra.mxu0 %v1193_v45  ;;  %1356 = vmatprep.mubr.bf16.mxu0 %v3427_v6  ;;  %v1491_v4 = vsel %vm1484_vm6, %v1477_v46, %v1479_v49 }
  0xdb   : > { %3177 = vmatprep.subr.msk.bf16.mxu0 %vm258_vm1, %v1486_v48  ;;  %v1481_v51 = vpop.permute.xlu0 %1480  ;;  %v1516_v7 = vsel %vm258_vm1, %v1491_v4, 0 }
  0xdc   : > { %v1492_v63 = vsel %vm1484_vm6, %v1479_v49, %v1481_v51 }
  0xdd   : > { %3171 = vmatmul.mubr.msk.bf16.vlgmr.msra.gmra.mrb[32].mxu1 %vm254_vm2, %v3164_v39  ;;  %v1483_v54 = vpop.permute.xlu1 %1482 }
  0xde   : > { %3270 = vmatpush3.bf16.msra.mxu1 %v1199_v50  ;;  %3271 = vmatprep.mubr.msk.bf16.mxu1 %vm3436_vm3, %v3435_v41  ;;  %v1493_v9 = vsel %vm1484_vm6, %v1481_v51, %v1483_v54  ;;  %v3029_v54 = vld [vmem:[%s4013_s2] sm:$0xff] }
  0xdf   : > { %3179 = vmatprep.subr.msk.bf16.mxu1 %vm258_vm1, %v1488_v53  ;;  %v1788_v56 = vpop.permute.xlu0 %1787  ;;  %v1522_v12 = vsel %vm258_vm1, %v1493_v9, 0  ;;  %v3197_v53 = vld [vmem:[%s4012_s1 + $0x18] sm:$0xf]  ;;  %3032 = vperm.xlu0 %3359, %v3029_v54  }
  0xe1   : > { %3173 = vmatmul.mubr.msk.bf16.vlgmr.msra.gmra.mrb[36].mxu0 %vm254_vm2, %v3164_v39  ;;  %v1790_v59 = vpop.permute.xlu1 %1789 }
  0xe2   : > { %1525 = vmatpush1.bf16.msra.mxu0 %v1498_v55  ;;  %1556 = vmatprep.mubr.bf16.mxu0 %v3427_v6  ;;  %v1808_v14 = vsel %vm1807_vm7, %v1788_v56, %v1790_v59 }
  0xe3   : > { %3181 = vmatprep.subr.msk.bf16.mxu0 %vm258_vm1, %v1490_v58  ;;  %v1792_v61 = vpop.permute.xlu0 %1791  ;;  %v1821_v17 = vsel %vm258_vm1, %v1808_v14, 0 }
  0xe4   : > { %v1809_v10 = vsel %vm1807_vm7, %v1790_v59, %v1792_v61 }
  0xe5   : > { %3272 = vmatmul.mubr.msk.bf16.vlgmr.msra.gmra.mrb[36].mxu1 %vm254_vm2, %v3164_v39  ;;  %v1794_v0 = vpop.permute.xlu1 %1793 }
  0xe6   : > { %1566 = vmatpush1.bf16.msra.mxu1 %v1504_v60  ;;  %1597 = vmatprep.mubr.bf16.mxu1 %v3427_v6  ;;  %v1810_v19 = vsel %vm1807_vm7, %v1792_v61, %v1794_v0 }
  0xe7   : > { %3183 = vmatprep.subr.msk.bf16.mxu1 %vm258_vm1, %v1492_v63  ;;  %v1796_v3 = vpop.permute.xlu0 %1795  ;;  %v1827_v22 = vsel %vm258_vm1, %v1810_v19, 0 }
  0xe8   : > { %v1811_v15 = vsel %vm1807_vm7, %v1794_v0, %v1796_v3 }
  0xe9   : > { %3178 = vmatmul.mubr.msk.bf16.vlgmr.msra.gmra.mrb[40].mxu0 %vm254_vm2, %v3175_v1  ;;  %v1798_v5 = vpop.permute.xlu1 %1797 }
  0xea   : > { %1607 = vmatpush1.bf16.msra.mxu0 %v1510_v2  ;;  %1638 = vmatprep.mubr.bf16.mxu0 %v3427_v6  ;;  %v1812_v24 = vsel %vm1807_vm7, %v1796_v3, %v1798_v5 }
  0xeb   : > { %3275 = vmatprep.subr.bf16.mxu0 %v3435_v41  ;;  %v1800_v8 = vpop.permute.xlu0 %1799  ;;  %v1833_v28 = vsel %vm258_vm1, %v1812_v24, 0 }
  0xec   : > { %v1813_v20 = vsel %vm1807_vm7, %v1798_v5, %v1800_v8 }
  0xed   : > { %3180 = vmatmul.mubr.msk.bf16.vlgmr.msra.gmra.mrb[40].mxu1 %vm254_vm2, %v3175_v1  ;;  %v1802_v11 = vpop.permute.xlu1 %1801 }
  0xee   : > { %1648 = vmatpush1.bf16.msra.mxu1 %v1516_v7  ;;  %1679 = vmatprep.mubr.bf16.mxu1 %v3427_v6  ;;  %v1814_v30 = vsel %vm1807_vm7, %v1800_v8, %v1802_v11 }
  0xef   : > { %3188 = vmatprep.subr.msk.bf16.mxu1 %vm258_vm1, %v1809_v10  ;;  %v1804_v13 = vpop.permute.xlu0 %1803  ;;  %v1839_v32 = vsel %vm258_vm1, %v1814_v30, 0 }
  0xf0   : > { %v1815_v25 = vsel %vm1807_vm7, %v1802_v11, %v1804_v13 }
  0xf1   : > { %3182 = vmatmul.mubr.msk.bf16.vlgmr.msra.gmra.mrb[44].mxu0 %vm254_vm2, %v3175_v1  ;;  %v1806_v16 = vpop.permute.xlu1 %1805 }
  0xf2   : > { %3276 = vmatpush3.bf16.msra.mxu0 %v1522_v12  ;;  %3277 = vmatprep.mubr.msk.bf16.mxu0 %vm3436_vm3, %v3435_v41  ;;  %v1816_v34 = vsel %vm1807_vm7, %v1804_v13, %v1806_v16 }
  0xf3   : > { %3190 = vmatprep.subr.msk.bf16.mxu0 %vm258_vm1, %v1811_v15  ;;  %v2111_v18 = vpop.permute.xlu0 %2110  ;;  %v1845_v37 = vsel %vm258_vm1, %v1816_v34, 0  ;;  %v3208_v15 = vld [vmem:[%s4012_s1 + $0x1c] sm:$0xf] }
  0xf5   : > { %3184 = vmatmul.mubr.msk.bf16.vlgmr.msra.gmra.mrb[44].mxu1 %vm254_vm2, %v3175_v1  ;;  %v2113_v21 = vpop.permute.xlu1 %2112 }
  0xf6   : > { %1848 = vmatpush1.bf16.msra.mxu1 %v1821_v17  ;;  %1879 = vmatprep.mubr.bf16.mxu1 %v3427_v6  ;;  %v2131_v39 = vsel %vm2130_vm8, %v2111_v18, %v2113_v21 }
  0xf7   : > { %3192 = vmatprep.subr.msk.bf16.mxu1 %vm258_vm1, %v1813_v20  ;;  %v2115_v23 = vpop.permute.xlu0 %2114  ;;  %v2144_v43 = vsel %vm258_vm1, %v2131_v39, 0 }
  0xf8   : > { %v2132_v35 = vsel %vm2130_vm8, %v2113_v21, %v2115_v23 }
  0xf9   : > { %3278 = vmatmul.mubr.msk.bf16.vlgmr.msra.gmra.mrb[48].mxu0 %vm254_vm2, %v3175_v1  ;;  %v2117_v26 = vpop.permute.xlu1 %2116 }
  0xfa   : > { %1889 = vmatpush1.bf16.msra.mxu0 %v1827_v22  ;;  %1920 = vmatprep.mubr.bf16.mxu0 %v3427_v6  ;;  %v2133_v45 = vsel %vm2130_vm8, %v2115_v23, %v2117_v26 }
  0xfb   : > { %3194 = vmatprep.subr.msk.bf16.mxu0 %vm258_vm1, %v1815_v25  ;;  %v2119_v29 = vpop.permute.xlu0 %2118  ;;  %v2150_v48 = vsel %vm258_vm1, %v2133_v45, 0 }
  0xfc   : > { %v2134_v40 = vsel %vm2130_vm8, %v2117_v26, %v2119_v29 }
  0xfd   : > { %3189 = vmatmul.mubr.msk.bf16.vlgmr.msra.gmra.mrb[48].mxu1 %vm254_vm2, %v3186_v27  ;;  %v2121_v31 = vpop.permute.xlu1 %2120 }
  0xfe   : > { %1930 = vmatpush1.bf16.msra.mxu1 %v1833_v28  ;;  %1961 = vmatprep.mubr.bf16.mxu1 %v3427_v6  ;;  %v2135_v49 = vsel %vm2130_vm8, %v2119_v29, %v2121_v31 }
  0xff   : > { %3281 = vmatprep.subr.bf16.mxu1 %v3435_v41  ;;  %v2123_v33 = vpop.permute.xlu0 %2122  ;;  %v2156_v55 = vsel %vm258_vm1, %v2135_v49, 0 }
 0x100   : > { %v2136_v46 = vsel %vm2130_vm8, %v2121_v31, %v2123_v33 }
 0x101   : > { %3191 = vmatmul.mubr.msk.bf16.vlgmr.msra.gmra.mrb[52].mxu0 %vm254_vm2, %v3186_v27  ;;  %v2125_v36 = vpop.permute.xlu1 %2124 }
 0x102   : > { %1971 = vmatpush1.bf16.msra.mxu0 %v1839_v32  ;;  %2002 = vmatprep.mubr.bf16.mxu0 %v3427_v6  ;;  %v2137_v56 = vsel %vm2130_vm8, %v2123_v33, %v2125_v36 }
 0x103   : > { %3199 = vmatprep.subr.msk.bf16.mxu0 %vm258_vm1, %v2132_v35  ;;  %v2127_v38 = vpop.permute.xlu0 %2126  ;;  %v2162_v59 = vsel %vm258_vm1, %v2137_v56, 0 }
 0x104   : > { %v2138_v50 = vsel %vm2130_vm8, %v2125_v36, %v2127_v38  ;;  %v3219_v36 = vld [vmem:[%s4012_s1 + $0x20] sm:$0xf] }
 0x105   : > { %3193 = vmatmul.mubr.msk.bf16.vlgmr.msra.gmra.mrb[52].mxu1 %vm254_vm2, %v3186_v27  ;;  %v2129_v42 = vpop.permute.xlu1 %2128 }
 0x106   : > { %3282 = vmatpush3.bf16.msra.mxu1 %v1845_v37  ;;  %3283 = vmatprep.mubr.msk.bf16.mxu1 %vm3436_vm3, %v3435_v41  ;;  %v2139_v60 = vsel %vm2130_vm8, %v2127_v38, %v2129_v42 }
 0x107   : > { %3201 = vmatprep.subr.msk.bf16.mxu1 %vm258_vm1, %v2134_v40  ;;  %v2434_v44 = vpop.permute.xlu0 %2433  ;;  %v2168_v0 = vsel %vm258_vm1, %v2139_v60, 0 }
 0x109   : > { %3195 = vmatmul.mubr.msk.bf16.vlgmr.msra.gmra.mrb[56].mxu0 %vm254_vm2, %v3186_v27  ;;  %v2436_v47 = vpop.permute.xlu1 %2435 }
 0x10a   : > { %2171 = vmatpush1.bf16.msra.mxu0 %v2144_v43  ;;  %2202 = vmatprep.mubr.bf16.mxu0 %v3427_v6  ;;  %v2454_v1 = vsel %vm2453_vm9, %v2434_v44, %v2436_v47 }
 0x10b   : > { %3203 = vmatprep.subr.msk.bf16.mxu0 %vm258_vm1, %v2136_v46  ;;  %v2467_v5 = vsel %vm258_vm1, %v2454_v1, 0 }
 0x10d   : > { %3284 = vmatmul.mubr.msk.bf16.vlgmr.msra.gmra.mrb[56].mxu1 %vm254_vm2, %v3186_v27  ;;  %v2438_v51 = vpop.permute.xlu0 %2437  ;;  %v2440_v52 = vpop.permute.xlu1 %2439 }
 0x10e   : > { %2212 = vmatpush1.bf16.msra.mxu1 %v2150_v48  ;;  %2243 = vmatprep.mubr.bf16.mxu1 %v3427_v6  ;;  %v2455_v61 = vsel %vm2453_vm9, %v2436_v47, %v2438_v51  ;;  %v2456_v7 = vsel %vm2453_vm9, %v2438_v51, %v2440_v52 }
 0x10f   : > { %3205 = vmatprep.subr.msk.bf16.mxu1 %vm258_vm1, %v2138_v50  ;;  %v2473_v10 = vsel %vm258_vm1, %v2456_v7, 0 }
 0x111   : > { %3200 = vmatmul.mubr.msk.bf16.vlgmr.msra.gmra.mrb[60].mxu0 %vm254_vm2, %v3197_v53  ;;  %v2442_v57 = vpop.permute.xlu0 %2441 }
 0x112   : > { %2253 = vmatpush1.bf16.msra.mxu0 %v2156_v55  ;;  %2284 = vmatprep.mubr.bf16.mxu0 %v3427_v6  ;;  %v2444_v58 = vpop.permute.xlu1 %2443  ;;  %v2457_v2 = vsel %vm2453_vm9, %v2440_v52, %v2442_v57 }
 0x113   : > { %3287 = vmatprep.subr.bf16.mxu0 %v3435_v41  ;;  %v2458_v12 = vsel %vm2453_vm9, %v2442_v57, %v2444_v58 }
 0x114   : > { %v2479_v16 = vsel %vm258_vm1, %v2458_v12, 0 }
 0x115   : > { %3202 = vmatmul.mubr.msk.bf16.vlgmr.msra.gmra.mrb[60].mxu1 %vm254_vm2, %v3197_v53  ;;  %v2446_v62 = vpop.permute.xlu0 %2445 }
 0x116   : > { %2294 = vmatpush1.bf16.msra.mxu1 %v2162_v59  ;;  %2325 = vmatprep.mubr.bf16.mxu1 %v3427_v6  ;;  %v2448_v63 = vpop.permute.xlu1 %2447  ;;  %v2459_v8 = vsel %vm2453_vm9, %v2444_v58, %v2446_v62 }
 0x117   : > { %3210 = vmatprep.subr.msk.bf16.mxu1 %vm258_vm1, %v2455_v61  ;;  %v2460_v17 = vsel %vm2453_vm9, %v2446_v62, %v2448_v63 }
 0x118   : > { %v2485_v20 = vsel %vm258_vm1, %v2460_v17, 0 }
 0x119   : > { %3204 = vmatmul.mubr.msk.bf16.vlgmr.msra.gmra.mrb[64].mxu0 %vm254_vm2, %v3197_v53  ;;  %v2450_v3 = vpop.permute.xlu0 %2449 }
 0x11a   : > { %3288 = vmatpush3.bf16.msra.mxu0 %v2168_v0  ;;  %3289 = vmatprep.mubr.msk.bf16.mxu0 %vm3436_vm3, %v3435_v41  ;;  %v2452_v4 = vpop.permute.xlu1 %2451  ;;  %v2461_v13 = vsel %vm2453_vm9, %v2448_v63, %v2450_v3 }
 0x11b   : > { %3212 = vmatprep.subr.msk.bf16.mxu0 %vm258_vm1, %v2457_v2  ;;  %v2462_v21 = vsel %vm2453_vm9, %v2450_v3, %v2452_v4 }
 0x11c   : > { %v2491_v23 = vsel %vm258_vm1, %v2462_v21, 0 }
 0x11d   : > { %3206 = vmatmul.mubr.msk.bf16.vlgmr.msra.gmra.mrb[64].mxu1 %vm254_vm2, %v3197_v53  ;;  %v2757_v9 = vpop.permute.xlu0 %2756 }
 0x11e   : > { %2494 = vmatpush1.bf16.msra.mxu1 %v2467_v5  ;;  %2525 = vmatprep.mubr.bf16.mxu1 %v3427_v6  ;;  %v2759_v11 = vpop.permute.xlu1 %2758 }
 0x11f   : > { %3214 = vmatprep.subr.msk.bf16.mxu1 %vm258_vm1, %v2459_v8  ;;  %v2777_v26 = vsel %vm2776_vm10, %v2757_v9, %v2759_v11 }
 0x120   : > { %v2790_v28 = vsel %vm258_vm1, %v2777_v26, 0 }
 0x121   : > { %3290 = vmatmul.mubr.msk.bf16.vlgmr.msra.gmra.mrb[68].mxu0 %vm254_vm2, %v3197_v53  ;;  %v2761_v14 = vpop.permute.xlu0 %2760 }
 0x122   : > { %2535 = vmatpush1.bf16.msra.mxu0 %v2473_v10  ;;  %2566 = vmatprep.mubr.bf16.mxu0 %v3427_v6  ;;  %v2763_v19 = vpop.permute.xlu1 %2762  ;;  %v2778_v22 = vsel %vm2776_vm10, %v2759_v11, %v2761_v14 }
 0x123   : > { %3216 = vmatprep.subr.msk.bf16.mxu0 %vm258_vm1, %v2461_v13  ;;  %v2779_v29 = vsel %vm2776_vm10, %v2761_v14, %v2763_v19 }
 0x124   : > { %v2796_v33 = vsel %vm258_vm1, %v2779_v29, 0 }
 0x125   : > { %3211 = vmatmul.mubr.msk.bf16.vlgmr.msra.gmra.mrb[68].mxu1 %vm254_vm2, %v3208_v15  ;;  %v2765_v18 = vpop.permute.xlu0 %2764 }
 0x126   : > { %2576 = vmatpush1.bf16.msra.mxu1 %v2479_v16  ;;  %2607 = vmatprep.mubr.bf16.mxu1 %v3427_v6  ;;  %v2767_v25 = vpop.permute.xlu1 %2766  ;;  %v2780_v27 = vsel %vm2776_vm10, %v2763_v19, %v2765_v18 }
 0x127   : > { %3293 = vmatprep.subr.bf16.mxu1 %v3435_v41  ;;  %v2781_v34 = vsel %vm2776_vm10, %v2765_v18, %v2767_v25 }
 0x128   : > { %v2802_v37 = vsel %vm258_vm1, %v2781_v34, 0 }
 0x129   : > { %3213 = vmatmul.mubr.msk.bf16.vlgmr.msra.gmra.mrb[72].mxu0 %vm254_vm2, %v3208_v15  ;;  %v2769_v24 = vpop.permute.xlu0 %2768 }
 0x12a   : > { %2617 = vmatpush1.bf16.msra.mxu0 %v2485_v20  ;;  %2648 = vmatprep.mubr.bf16.mxu0 %v3427_v6  ;;  %v2782_v30 = vsel %vm2776_vm10, %v2767_v25, %v2769_v24  ;;  %v2771_v32 = vpop.permute.xlu1 %2770 }
 0x12b   : > { %3221 = vmatprep.subr.msk.bf16.mxu0 %vm258_vm1, %v2778_v22  ;;  %v2783_v38 = vsel %vm2776_vm10, %v2769_v24, %v2771_v32 }
 0x12c   : > { %v2808_v40 = vsel %vm258_vm1, %v2783_v38, 0 }
 0x12d   : > { %3215 = vmatmul.mubr.msk.bf16.vlgmr.msra.gmra.mrb[72].mxu1 %vm254_vm2, %v3208_v15  ;;  %v2773_v31 = vpop.permute.xlu0 %2772 }
 0x12e   : > { %3294 = vmatpush3.bf16.msra.mxu1 %v2491_v23  ;;  %3295 = vmatprep.mubr.msk.bf16.mxu1 %vm3436_vm3, %v3435_v41  ;;  %v2784_v35 = vsel %vm2776_vm10, %v2771_v32, %v2773_v31  ;;  %v2775_v39 = vpop.permute.xlu1 %2774 }
 0x12f   : > { %3223 = vmatprep.subr.msk.bf16.mxu1 %vm258_vm1, %v2780_v27  ;;  %v2785_v42 = vsel %vm2776_vm10, %v2773_v31, %v2775_v39 }
 0x130   : > { %v2814_v43 = vsel %vm258_vm1, %v2785_v42, 0 }
 0x131   : > { %3217 = vmatmul.mubr.msk.bf16.vlgmr.msra.gmra.mrb[76].mxu0 %vm254_vm2, %v3208_v15 }
 0x132   : > { %2817 = vmatpush1.bf16.msra.mxu0 %v2790_v28  ;;  %2848 = vmatprep.mubr.bf16.mxu0 %v3427_v6 }
 0x133   : > { %3225 = vmatprep.subr.msk.bf16.mxu0 %vm258_vm1, %v2782_v30 }
 0x135   : > { %3296 = vmatmul.mubr.msk.bf16.vlgmr.msra.gmra.mrb[76].mxu1 %vm254_vm2, %v3208_v15 }
 0x136   : > { %2858 = vmatpush1.bf16.msra.mxu1 %v2796_v33  ;;  %2889 = vmatprep.mubr.bf16.mxu1 %v3427_v6 }
 0x137   : > { %3227 = vmatprep.subr.msk.bf16.mxu1 %vm258_vm1, %v2784_v35 }
 0x139   : > { %3222 = vmatmul.mubr.msk.bf16.vlgmr.msra.gmra.mrb[80].mxu0 %vm254_vm2, %v3219_v36 }
 0x13a   : > { %2899 = vmatpush1.bf16.msra.mxu0 %v2802_v37  ;;  %2930 = vmatprep.mubr.bf16.mxu0 %v3427_v6 }
 0x13b   : > { %3299 = vmatprep.subr.bf16.mxu0 %v3435_v41 }
 0x13d   : > { %3224 = vmatmul.mubr.msk.bf16.vlgmr.msra.gmra.mrb[80].mxu1 %vm254_vm2, %v3219_v36 }
 0x13e   : > { %2940 = vmatpush1.bf16.msra.mxu1 %v2808_v40  ;;  %2971 = vmatprep.mubr.bf16.mxu1 %v3427_v6 }
 0x141   : > { %3226 = vmatmul.mubr.msk.bf16.vlgmr.msra.gmra.mrb[84].mxu0 %vm254_vm2, %v3219_v36 }
 0x142   : > { %3300 = vmatpush3.bf16.msra.mxu0 %v2814_v43  ;;  %3301 = vmatprep.mubr.msk.bf16.mxu0 %vm3436_vm3, %v3435_v41 }
 0x145   : > { %3228 = vmatmul.mubr.msk.bf16.vlgmr.msra.gmra.mrb[84].mxu1 %vm254_vm2, %v3219_v36 }
 0x149   : > { %3302 = vmatmul.mubr.msk.bf16.vlgmr.msra.gmra.mrb[88].mxu0 %vm254_vm2, %v3219_v36 }
 0x16c   : > { %v320_v44 = vpop.f32.mrb[0].mxu0 }
 0x16d   : > { %v322_v45 = vpop.f32.mrb[1].mxu0 }
 0x16e   : > { %v324_v46 = vpop.f32.mrb[2].mxu0 }
 0x16f   : > { %v325_v47 = vpop.f32.mrb[3].mxu0 }
 0x170   : > { %v361_v48 = vpop.f32.mrb[0].mxu1 }
 0x171   : > { %v363_v49 = vpop.f32.mrb[1].mxu1 }
 0x172   : > { %v365_v50 = vpop.f32.mrb[2].mxu1 }
 0x173   : > { %v366_v6 = vpop.f32.mrb[3].mxu1 }
 0x174   : > { %v402_v51 = vpop.f32.mrb[4].mxu0 }
 0x175   : > { %v404_v52 = vpop.f32.mrb[5].mxu0 }
 0x176   : > { %v406_v53 = vpop.f32.mrb[6].mxu0 }
 0x177   : > { %v407_v54 = vpop.f32.mrb[7].mxu0 }
 0x178   : > { %v443_v55 = vpop.f32.mrb[4].mxu1 }
 0x179   : > { %v445_v56 = vpop.f32.mrb[5].mxu1 }
 0x17a   : > { %v447_v57 = vpop.f32.mrb[6].mxu1 }
 0x17b   : > { %v448_v41 = vpop.f32.mrb[7].mxu1 }
 0x17c   : > { %v484_v58 = vpop.f32.mrb[8].mxu0 }
 0x17d   : > { %v3255_v59 = vpop.f32.mrb[9].mxu0 }
 0x17e   : > { %v487_v60 = vpop.f32.mrb[10].mxu0 }
 0x17f   : > { %v3256_v61 = vpop.f32.mrb[11].mxu0 }
 0x180   : > { %v598_v62 = vpop.f32.mrb[8].mxu1 }
 0x181   : > { %v599_v63 = vadd.f32 %v598_v62, %v320_v44  ;;  %v600_v0 = vpop.f32.mrb[9].mxu1 }
 0x182   : > { %v601_v1 = vadd.f32 %v600_v0, %v322_v45  ;;  %v602_v2 = vpop.f32.mrb[10].mxu1 }
 0x183   : > { %v603_v3 = vpop.f32.mrb[11].mxu1 }
 0x184   : > { %v639_v4 = vpop.f32.mrb[12].mxu0 }
 0x185   : > { %v640_v5 = vadd.f32 %v639_v4, %v361_v48  ;;  %v641_v7 = vpop.f32.mrb[13].mxu0 }
 0x186   : > { %v642_v8 = vadd.f32 %v641_v7, %v363_v49  ;;  %v643_v9 = vpop.f32.mrb[14].mxu0 }
 0x187   : > { %v644_v10 = vpop.f32.mrb[15].mxu0 }
 0x188   : > { %v680_v11 = vpop.f32.mrb[12].mxu1 }
 0x189   : > { %v681_v12 = vadd.f32 %v680_v11, %v402_v51  ;;  %v682_v13 = vpop.f32.mrb[13].mxu1 }
 0x18a   : > { %v683_v14 = vadd.f32 %v682_v13, %v404_v52  ;;  %v684_v15 = vpop.f32.mrb[14].mxu1 }
 0x18b   : > { %v685_v16 = vpop.f32.mrb[15].mxu1 }
 0x18c   : > { %v721_v17 = vpop.f32.mrb[16].mxu0 }
 0x18d   : > { %v722_v18 = vadd.f32 %v721_v17, %v443_v55  ;;  %v723_v19 = vpop.f32.mrb[17].mxu0 }
 0x18e   : > { %v724_v20 = vadd.f32 %v723_v19, %v445_v56  ;;  %v725_v21 = vpop.f32.mrb[18].mxu0 }
 0x18f   : > { %v726_v22 = vpop.f32.mrb[19].mxu0 }
 0x190   : > { %v762_v23 = vpop.f32.mrb[16].mxu1 }
 0x191   : > { %v763_v24 = vadd.f32 %v762_v23, %v484_v58  ;;  %v3261_v25 = vpop.f32.mrb[17].mxu1 }
 0x192   : > { %v765_v26 = vpop.f32.mrb[18].mxu1 }
 0x193   : > { %v3262_v27 = vpop.f32.mrb[19].mxu1 }
 0x194   : > { %v912_v28 = vpop.f32.mrb[20].mxu0 }
 0x195   : > { %v1082_v29 = vadd.f32 %v912_v28, %v599_v63  ;;  %v914_v30 = vpop.f32.mrb[21].mxu0 }
 0x196   : > { %v1083_v31 = vadd.f32 %v914_v30, %v601_v1  ;;  %v916_v32 = vpop.f32.mrb[22].mxu0 }
 0x197   : > { %v917_v33 = vpop.f32.mrb[23].mxu0 }
 0x198   : > { %v953_v34 = vpop.f32.mrb[20].mxu1 }
 0x199   : > { %v1084_v35 = vadd.f32 %v953_v34, %v640_v5  ;;  %v955_v36 = vpop.f32.mrb[21].mxu1 }
 0x19a   : > { %v1085_v37 = vadd.f32 %v955_v36, %v642_v8  ;;  %v957_v38 = vpop.f32.mrb[22].mxu1 }
 0x19b   : > { %v958_v39 = vpop.f32.mrb[23].mxu1 }
 0x19c   : > { %v994_v40 = vpop.f32.mrb[24].mxu0 }
 0x19d   : > { %v1086_v42 = vadd.f32 %v994_v40, %v681_v12  ;;  %v996_v43 = vpop.f32.mrb[25].mxu0 }
 0x19e   : > { %v1087_v44 = vadd.f32 %v996_v43, %v683_v14  ;;  %v998_v45 = vpop.f32.mrb[26].mxu0 }
 0x19f   : > { %v999_v46 = vpop.f32.mrb[27].mxu0 }
 0x1a0   : > { %v1035_v47 = vpop.f32.mrb[24].mxu1 }
 0x1a1   : > { %v1088_v48 = vadd.f32 %v1035_v47, %v722_v18  ;;  %v1037_v49 = vpop.f32.mrb[25].mxu1 }
 0x1a2   : > { %v1089_v50 = vadd.f32 %v1037_v49, %v724_v20  ;;  %v1039_v6 = vpop.f32.mrb[26].mxu1 }
 0x1a3   : > { %v1040_v51 = vpop.f32.mrb[27].mxu1 }
 0x1a4   : > { %v1076_v52 = vpop.f32.mrb[28].mxu0 }
 0x1a5   : > { %v1090_v53 = vadd.f32 %v1076_v52, %v763_v24  ;;  %v3267_v54 = vpop.f32.mrb[29].mxu0 }
 0x1a6   : > { %v1079_v55 = vpop.f32.mrb[30].mxu0 }
 0x1a7   : > { %v3268_v56 = vpop.f32.mrb[31].mxu0 }
 0x1a8   : > { %v1235_v57 = vpop.f32.mrb[28].mxu1 }
 0x1a9   : > { %v1405_v41 = vadd.f32 %v1235_v57, %v1082_v29  ;;  %v1237_v58 = vpop.f32.mrb[29].mxu1 }
 0x1aa   : > { %v1406_v59 = vadd.f32 %v1237_v58, %v1083_v31  ;;  %v1239_v60 = vpop.f32.mrb[30].mxu1 }
 0x1ab   : > { %v1240_v61 = vpop.f32.mrb[31].mxu1 }
 0x1ac   : > { %v1276_v62 = vpop.f32.mrb[32].mxu0 }
 0x1ad   : > { %v1407_v63 = vadd.f32 %v1276_v62, %v1084_v35  ;;  %v1278_v0 = vpop.f32.mrb[33].mxu0 }
 0x1ae   : > { %v1408_v1 = vadd.f32 %v1278_v0, %v1085_v37  ;;  %v1280_v2 = vpop.f32.mrb[34].mxu0 }
 0x1af   : > { %v1281_v3 = vpop.f32.mrb[35].mxu0 }
 0x1b0   : > { %v1317_v4 = vpop.f32.mrb[32].mxu1 }
 0x1b1   : > { %v1409_v5 = vadd.f32 %v1317_v4, %v1086_v42  ;;  %v1319_v7 = vpop.f32.mrb[33].mxu1 }
 0x1b2   : > { %v1410_v8 = vadd.f32 %v1319_v7, %v1087_v44  ;;  %v1321_v9 = vpop.f32.mrb[34].mxu1 }
 0x1b3   : > { %v1322_v10 = vpop.f32.mrb[35].mxu1 }
 0x1b4   : > { %v1358_v11 = vpop.f32.mrb[36].mxu0 }
 0x1b5   : > { %v1411_v12 = vadd.f32 %v1358_v11, %v1088_v48  ;;  %v1360_v13 = vpop.f32.mrb[37].mxu0 }
 0x1b6   : > { %v1412_v14 = vadd.f32 %v1360_v13, %v1089_v50  ;;  %v1362_v15 = vpop.f32.mrb[38].mxu0 }
 0x1b7   : > { %v1363_v16 = vpop.f32.mrb[39].mxu0 }
 0x1b8   : > { %v1399_v17 = vpop.f32.mrb[36].mxu1 }
 0x1b9   : > { %v1413_v18 = vadd.f32 %v1399_v17, %v1090_v53  ;;  %v3273_v19 = vpop.f32.mrb[37].mxu1 }
 0x1ba   : > { %v1402_v20 = vpop.f32.mrb[38].mxu1 }
 0x1bb   : > { %v3274_v21 = vpop.f32.mrb[39].mxu1 }
 0x1bc   : > { %v1558_v22 = vpop.f32.mrb[40].mxu0 }
 0x1bd   : > { %v1728_v23 = vadd.f32 %v1558_v22, %v1405_v41  ;;  %v1560_v24 = vpop.f32.mrb[41].mxu0 }
 0x1be   : > { %v1729_v25 = vadd.f32 %v1560_v24, %v1406_v59  ;;  %v1562_v26 = vpop.f32.mrb[42].mxu0 }
 0x1bf   : > { %v1563_v27 = vpop.f32.mrb[43].mxu0 }
 0x1c0   : > { %v1599_v28 = vpop.f32.mrb[40].mxu1 }
 0x1c1   : > { %v1730_v29 = vadd.f32 %v1599_v28, %v1407_v63  ;;  %v1601_v30 = vpop.f32.mrb[41].mxu1 }
 0x1c2   : > { %v1731_v31 = vadd.f32 %v1601_v30, %v1408_v1  ;;  %v1603_v32 = vpop.f32.mrb[42].mxu1 }
 0x1c3   : > { %v1604_v33 = vpop.f32.mrb[43].mxu1 }
 0x1c4   : > { %v1640_v34 = vpop.f32.mrb[44].mxu0 }
 0x1c5   : > { %v1732_v35 = vadd.f32 %v1640_v34, %v1409_v5  ;;  %v1642_v36 = vpop.f32.mrb[45].mxu0 }
 0x1c6   : > { %v1733_v37 = vadd.f32 %v1642_v36, %v1410_v8  ;;  %v1644_v38 = vpop.f32.mrb[46].mxu0 }
 0x1c7   : > { %v1645_v39 = vpop.f32.mrb[47].mxu0 }
 0x1c8   : > { %v1681_v40 = vpop.f32.mrb[44].mxu1 }
 0x1c9   : > { %v1734_v42 = vadd.f32 %v1681_v40, %v1411_v12  ;;  %v1683_v43 = vpop.f32.mrb[45].mxu1 }
 0x1ca   : > { %v1735_v44 = vadd.f32 %v1683_v43, %v1412_v14  ;;  %v1685_v45 = vpop.f32.mrb[46].mxu1 }
 0x1cb   : > { %v1686_v46 = vpop.f32.mrb[47].mxu1 }
 0x1cc   : > { %v1722_v47 = vpop.f32.mrb[48].mxu0 }
 0x1cd   : > { %v1736_v48 = vadd.f32 %v1722_v47, %v1413_v18  ;;  %v3279_v49 = vpop.f32.mrb[49].mxu0 }
 0x1ce   : > { %v1725_v50 = vpop.f32.mrb[50].mxu0 }
 0x1cf   : > { %v3280_v6 = vpop.f32.mrb[51].mxu0 }
 0x1d0   : > { %v1881_v51 = vpop.f32.mrb[48].mxu1 }
 0x1d1   : > { %v2051_v52 = vadd.f32 %v1881_v51, %v1728_v23  ;;  %v1883_v53 = vpop.f32.mrb[49].mxu1 }
 0x1d2   : > { %v2052_v54 = vadd.f32 %v1883_v53, %v1729_v25  ;;  %v1885_v55 = vpop.f32.mrb[50].mxu1 }
 0x1d3   : > { %v1886_v56 = vpop.f32.mrb[51].mxu1 }
 0x1d4   : > { %v1922_v57 = vpop.f32.mrb[52].mxu0 }
 0x1d5   : > { %v2053_v41 = vadd.f32 %v1922_v57, %v1730_v29  ;;  %v1924_v58 = vpop.f32.mrb[53].mxu0 }
 0x1d6   : > { %v2054_v59 = vadd.f32 %v1924_v58, %v1731_v31  ;;  %v1926_v60 = vpop.f32.mrb[54].mxu0 }
 0x1d7   : > { %v1927_v61 = vpop.f32.mrb[55].mxu0 }
 0x1d8   : > { %v1963_v62 = vpop.f32.mrb[52].mxu1 }
 0x1d9   : > { %v2055_v63 = vadd.f32 %v1963_v62, %v1732_v35  ;;  %v1965_v0 = vpop.f32.mrb[53].mxu1 }
 0x1da   : > { %v2056_v1 = vadd.f32 %v1965_v0, %v1733_v37  ;;  %v1967_v2 = vpop.f32.mrb[54].mxu1 }
 0x1db   : > { %v1968_v3 = vpop.f32.mrb[55].mxu1 }
 0x1dc   : > { %v2004_v4 = vpop.f32.mrb[56].mxu0 }
 0x1dd   : > { %v2057_v5 = vadd.f32 %v2004_v4, %v1734_v42  ;;  %v2006_v7 = vpop.f32.mrb[57].mxu0 }
 0x1de   : > { %v2058_v8 = vadd.f32 %v2006_v7, %v1735_v44  ;;  %v2008_v9 = vpop.f32.mrb[58].mxu0 }
 0x1df   : > { %v2009_v10 = vpop.f32.mrb[59].mxu0 }
 0x1e0   : > { %v2045_v11 = vpop.f32.mrb[56].mxu1 }
 0x1e1   : > { %v2059_v12 = vadd.f32 %v2045_v11, %v1736_v48  ;;  %v3285_v13 = vpop.f32.mrb[57].mxu1  ;;  %v3033_v11 = vpop.permute.xlu0 %3032 }
 0x1e2   : > { %v2048_v14 = vpop.f32.mrb[58].mxu1 }
 0x1e3   : > { %v3286_v15 = vpop.f32.mrb[59].mxu1 }
 0x1e4   : > { %v2204_v16 = vpop.f32.mrb[60].mxu0 }
 0x1e5   : > { %v2374_v17 = vadd.f32 %v2204_v16, %v2051_v52  ;;  %v2206_v18 = vpop.f32.mrb[61].mxu0 }
 0x1e6   : > { %v2375_v19 = vadd.f32 %v2206_v18, %v2052_v54  ;;  %v2208_v20 = vpop.f32.mrb[62].mxu0 }
 0x1e7   : > { %v2209_v21 = vpop.f32.mrb[63].mxu0 }
 0x1e8   : > { %v2245_v22 = vpop.f32.mrb[60].mxu1 }
 0x1e9   : > { %v2376_v23 = vadd.f32 %v2245_v22, %v2053_v41  ;;  %v2247_v24 = vpop.f32.mrb[61].mxu1 }
 0x1ea   : > { %v2377_v25 = vadd.f32 %v2247_v24, %v2054_v59  ;;  %v2249_v26 = vpop.f32.mrb[62].mxu1 }
 0x1eb   : > { %v2250_v27 = vpop.f32.mrb[63].mxu1 }
 0x1ec   : > { %v2286_v28 = vpop.f32.mrb[64].mxu0 }
 0x1ed   : > { %v2378_v29 = vadd.f32 %v2286_v28, %v2055_v63  ;;  %v2288_v30 = vpop.f32.mrb[65].mxu0 }
 0x1ee   : > { %v2379_v31 = vadd.f32 %v2288_v30, %v2056_v1  ;;  %v2290_v32 = vpop.f32.mrb[66].mxu0 }
 0x1ef   : > { %v2291_v33 = vpop.f32.mrb[67].mxu0 }
 0x1f0   : > { %v2327_v34 = vpop.f32.mrb[64].mxu1 }
 0x1f1   : > { %v2380_v35 = vadd.f32 %v2327_v34, %v2057_v5  ;;  %v2329_v36 = vpop.f32.mrb[65].mxu1 }
 0x1f2   : > { %v2381_v37 = vadd.f32 %v2329_v36, %v2058_v8  ;;  %v2331_v38 = vpop.f32.mrb[66].mxu1 }
 0x1f3   : > { %v2332_v39 = vpop.f32.mrb[67].mxu1 }
 0x1f4   : > { %v2368_v40 = vpop.f32.mrb[68].mxu0 }
 0x1f5   : > { %v2382_v42 = vadd.f32 %v2368_v40, %v2059_v12  ;;  %v3291_v43 = vpop.f32.mrb[69].mxu0 }
 0x1f6   : > { %v2371_v44 = vpop.f32.mrb[70].mxu0 }
 0x1f7   : > { %v3292_v45 = vpop.f32.mrb[71].mxu0 }
 0x1f8   : > { %v2527_v46 = vpop.f32.mrb[68].mxu1 }
 0x1f9   : > { %v2697_v47 = vadd.f32 %v2527_v46, %v2374_v17  ;;  %v2529_v48 = vpop.f32.mrb[69].mxu1 }
 0x1fa   : > { %v2698_v49 = vadd.f32 %v2529_v48, %v2375_v19  ;;  %v2531_v50 = vpop.f32.mrb[70].mxu1 }
 0x1fb   : > { %v2532_v6 = vpop.f32.mrb[71].mxu1 }
 0x1fc   : > { %v2568_v51 = vpop.f32.mrb[72].mxu0 }
 0x1fd   : > { %v2699_v52 = vadd.f32 %v2568_v51, %v2376_v23  ;;  %v2570_v53 = vpop.f32.mrb[73].mxu0 }
 0x1fe   : > { %v2700_v54 = vadd.f32 %v2570_v53, %v2377_v25  ;;  %v2572_v55 = vpop.f32.mrb[74].mxu0 }
 0x1ff   : > { %v2573_v56 = vpop.f32.mrb[75].mxu0 }
 0x200   : > { %v2609_v57 = vpop.f32.mrb[72].mxu1 }
 0x201   : > { %v2701_v41 = vadd.f32 %v2609_v57, %v2378_v29  ;;  %v2611_v58 = vpop.f32.mrb[73].mxu1 }
 0x202   : > { %v2702_v59 = vadd.f32 %v2611_v58, %v2379_v31  ;;  %v2613_v60 = vpop.f32.mrb[74].mxu1 }
 0x203   : > { %v2614_v61 = vpop.f32.mrb[75].mxu1 }
 0x204   : > { %v2650_v62 = vpop.f32.mrb[76].mxu0 }
 0x205   : > { %v2703_v63 = vadd.f32 %v2650_v62, %v2380_v35  ;;  %v2652_v0 = vpop.f32.mrb[77].mxu0 }
 0x206   : > { %v2704_v1 = vadd.f32 %v2652_v0, %v2381_v37  ;;  %v2654_v2 = vpop.f32.mrb[78].mxu0 }
 0x207   : > { %v2655_v3 = vpop.f32.mrb[79].mxu0 }
 0x208   : > { %v2691_v4 = vpop.f32.mrb[76].mxu1 }
 0x209   : > { %v2705_v5 = vadd.f32 %v2691_v4, %v2382_v42  ;;  %v3297_v7 = vpop.f32.mrb[77].mxu1 }
 0x20a   : > { %v2694_v8 = vpop.f32.mrb[78].mxu1 }
 0x20b   : > { %v3298_v9 = vpop.f32.mrb[79].mxu1 }
 0x20c   : > { %v2850_v10 = vpop.f32.mrb[80].mxu0 }
 0x20d   : > { %v3020_v12 = vadd.f32 %v2850_v10, %v2697_v47  ;;  %v2852_v13 = vpop.f32.mrb[81].mxu0 }
 0x20e   : > { %v3021_v14 = vadd.f32 %v2852_v13, %v2698_v49  ;;  %v2854_v15 = vpop.f32.mrb[82].mxu0 }
 0x20f   : > { %v3035_v16 = vadd.f32 %v3033_v11, %v3020_v12  ;;  %v2855_v17 = vpop.f32.mrb[83].mxu0 }
 0x210   : > { %v3036_v18 = vadd.f32 %v3033_v11, %v3021_v14  ;;  %v2891_v19 = vpop.f32.mrb[80].mxu1 }
 0x211   : > { %3044 = vst [vmem:[%s3951_s20] sm:$0xff] %v3035_v16  ;;  %v3022_v20 = vadd.f32 %v2891_v19, %v2699_v52  ;;  %v2893_v21 = vpop.f32.mrb[81].mxu1 }
 0x212   : > { %3045 = vst [vmem:[%s3951_s20 + $0x8] sm:$0xff] %v3036_v18  ;;  %v3023_v22 = vadd.f32 %v2893_v21, %v2700_v54  ;;  %v2895_v23 = vpop.f32.mrb[82].mxu1 }
 0x213   : > { %v3037_v24 = vadd.f32 %v3033_v11, %v3022_v20  ;;  %v2896_v25 = vpop.f32.mrb[83].mxu1 }
 0x214   : > { %v3038_v26 = vadd.f32 %v3033_v11, %v3023_v22  ;;  %v2932_v27 = vpop.f32.mrb[84].mxu0 }
 0x215   : > { %3046 = vst [vmem:[%s3951_s20 + $0x10] sm:$0xff] %v3037_v24  ;;  %v3024_v28 = vadd.f32 %v2932_v27, %v2701_v41  ;;  %v2934_v29 = vpop.f32.mrb[85].mxu0 }
 0x216   : > { %3047 = vst [vmem:[%s3951_s20 + $0x18] sm:$0xff] %v3038_v26  ;;  %v3025_v30 = vadd.f32 %v2934_v29, %v2702_v59  ;;  %v2936_v31 = vpop.f32.mrb[86].mxu0 }
 0x217   : > { %v3039_v32 = vadd.f32 %v3033_v11, %v3024_v28  ;;  %v2937_v33 = vpop.f32.mrb[87].mxu0 }
 0x218   : > { %v3040_v34 = vadd.f32 %v3033_v11, %v3025_v30  ;;  %v2973_v35 = vpop.f32.mrb[84].mxu1 }
 0x219   : > { %3048 = vst [vmem:[%s3951_s20 + $0x20] sm:$0xff] %v3039_v32  ;;  %v3026_v36 = vadd.f32 %v2973_v35, %v2703_v63  ;;  %v2975_v37 = vpop.f32.mrb[85].mxu1 }
 0x21a   : > { %3049 = vst [vmem:[%s3951_s20 + $0x28] sm:$0xff] %v3040_v34  ;;  %v3027_v38 = vadd.f32 %v2975_v37, %v2704_v1  ;;  %v2977_v39 = vpop.f32.mrb[86].mxu1 }
 0x21b   : > { %v3041_v40 = vadd.f32 %v3033_v11, %v3026_v36  ;;  %v2978_v42 = vpop.f32.mrb[87].mxu1 }
 0x21c   : > { %v3042_v43 = vadd.f32 %v3033_v11, %v3027_v38  ;;  %v3014_v44 = vpop.f32.mrb[88].mxu0 }
 0x21d   : > { %3050 = vst [vmem:[%s3951_s20 + $0x30] sm:$0xff] %v3041_v40  ;;  %v3028_v45 = vadd.f32 %v3014_v44, %v2705_v5  ;;  %v3303_v46 = vpop.f32.mrb[89].mxu0 }
 0x21e   : > { %3051 = vst [vmem:[%s3951_s20 + $0x38] sm:$0xff] %v3042_v43  ;;  %v3017_v47 = vpop.f32.mrb[90].mxu0 }
 0x21f   : > { %v3043_v48 = vadd.f32 %v3033_v11, %v3028_v45  ;;  %v3304_v49 = vpop.f32.mrb[91].mxu0 }
 0x221   : > { %3052 = vst [vmem:[%s3951_s20 + $0x40] sm:$0xff] %v3043_v48 }
 0x222   : > { %3375 = shalt.err (!%p3372_p3)
}
 0x223   : > { %s3376_s6 = scalar_lea.hbm %s3966_s28, 1152  ;;  %s3380_s9 = scalar_lea.hbm %s4014_s3, 2304 }
 0x224   : > { %p3377_p4 = scmp.ne.s32.totalorder %s3966_s28, %s3376_s6  ;;  %p3381_p9 = scmp.lt.u32.totalorder %s3966_s28, %s4014_s3 }
 0x225   : > { %p3382_p10 = scmp.lt.u32.totalorder %s3380_s9, %s3376_s6  ;;  %p3384_p12 = scmp.lt.u32.totalorder %s3376_s6, %s3966_s28 }
 0x226   : > { %p3378_p7 = pnand %p3377_p4, %p3497_p5 }
 0x227   : > { %p3383_p11 = por %p3382_p10, %p3381_p9 }
 0x228   : > { %p3379_p8 = pneg %p3378_p7 }
 0x229   : > { %p3385_p13 = por %p3384_p12, %p3383_p11 }
 0x22b   : > { %p3386_p0 = pnand %p3385_p13, %p3379_p8 }
 0x22d   : > { %3389 = shalt.err (!%p3386_p0)
}
 0x22e   : > { %3308 = dma.vmem_to_hbm [thread:$0]  (%p3497_p5), %s3968_s25, 1152, %s3966_s28, %s3054_s16  }
 0x22f PF: > { %p3314_p1 = scmp.ge.s32.totalorder %s3424_s15, 2  ;;  %s3080_s17 = sand.u32 1, %s3412_s12  }
 0x230   : > { %s3081_s19 = scalar_lea.sflag [#allocation3], %s3080_s17 }
 0x231   : > { %p3311_p2 = pnand %p3314_p1, %p3501_p6 }
 0x233   : > { %3407 = dma.done.wait (!%p3311_p2), %s3081_s19, 1152  }
 0x234   : > { %3409 = vsyncadd (!%p3311_p2), %s3081_s19, 4294966144  ;;  %p13_p3 = scmp.ge.s32.totalorder %s3484_s18, 4   ;;  %s4017_s12 = smov %s3416_s13 }
 0x235   : > { %s4018_s13 = smov %s3420_s14  ;;  %s4019_s14 = smov %s3495_s21 }
 0x236   : > { %s4020_s15 = smov %s3484_s18  ;;  %15 = sbr.rel (!%p13_p3) target bundleno = 3 (0x3), region = 75 }
 0x23d   :  { %3086 = vsyncpa [#allocation3], 1 }
 0x23e   :  { %3088 = vsyncpa [#allocation3 + $0x1], 1 }

</bundles_post_ra>
